<compile_context>
chip_gen: v7x
topology: tpu7x:2x2x1
jax: 0.10.0
libtpu: 0.0.40
codegen_flags: <defaults>
</compile_context>

<pallas_src>
import functools

import jax
import jax.numpy as jnp
from jax.experimental import pallas as pl
from jax.experimental.pallas import tpu as pltpu


def _recip(x):
    # approx reciprocal goes to the EUP (otherwise-idle slot); fall back to a
    # plain divide if this jax version lacks pl.reciprocal.
    if hasattr(pl, "reciprocal"):
        return pl.reciprocal(x, approx=True)
    return 1.0 / x


# ----------------------------------------------------------------------------
# fused attention-pool kernel (one batch element per grid step)
# ----------------------------------------------------------------------------
def _attnpool_kernel(x_ref, pos0_ref, poss_ref,
                     wq_ref, bq_ref, wk_ref, bk_ref, wv_ref, bv_ref,
                     sel_ref, selt_ref, wc_ref, bc_ref, o_ref):
    f32 = jnp.float32
    bf16 = jnp.bfloat16

    t = x_ref[0]                                          # (HW, C) spatial tokens, f32
    mean = jnp.mean(t, axis=0, keepdims=True)             # (1, C) mean token (pre pos-add)
    x0 = mean + pos0_ref[...]                             # (1, C)  query token
    xs = t + poss_ref[...]                                # (HW, C) key/value tokens

    x0b = x0.astype(bf16)
    xsb = xs.astype(bf16)

    # projections: bf16 MXU matmuls, f32 accumulation.
    # Wq / bq already carry the head_dim**-0.5 scaling (folded in the wrapper).
    q = jnp.dot(x0b, wq_ref[...], preferred_element_type=f32) + bq_ref[...]    # (1, C)
    k0 = jnp.dot(x0b, wk_ref[...], preferred_element_type=f32) + bk_ref[...]   # (1, C)
    ks = jnp.dot(xsb, wk_ref[...], preferred_element_type=f32) + bk_ref[...]   # (HW, C)
    v0 = jnp.dot(x0b, wv_ref[...], preferred_element_type=f32) + bv_ref[...]   # (1, C)
    vs = jnp.dot(xsb, wv_ref[...], preferred_element_type=f32) + bv_ref[...]   # (HW, C)

    # per-head scores via the constant 0/1 head-selector sel (C, n_head):
    #   s[l, h] = sum_{d in head h} q[d] * k[l, d]
    s0 = jnp.dot((k0 * q).astype(bf16), sel_ref[...], preferred_element_type=f32)  # (1, nh)
    ss = jnp.dot((ks * q).astype(bf16), sel_ref[...], preferred_element_type=f32)  # (HW, nh)

    # numerically-stable softmax over the (1 + HW) key positions, f32
    m = jnp.maximum(s0, jnp.max(ss, axis=0, keepdims=True))        # (1, nh)
    p0 = jnp.exp(s0 - m)                                           # (1, nh)
    ps = jnp.exp(ss - m)                                           # (HW, nh)
    rden = _recip(p0 + jnp.sum(ps, axis=0, keepdims=True))         # (1, nh)
    p0 = p0 * rden
    ps = ps * rden

    # broadcast head weights back to channels (selt = sel^T) and pool values
    pc0 = jnp.dot(p0.astype(bf16), selt_ref[...], preferred_element_type=f32)  # (1, C)
    pcs = jnp.dot(ps.astype(bf16), selt_ref[...], preferred_element_type=f32)  # (HW, C)
    pooled = pc0 * v0 + jnp.sum(pcs * vs, axis=0, keepdims=True)               # (1, C)

    # output projection (c_proj)
    out = jnp.dot(pooled.astype(bf16), wc_ref[...],
                  preferred_element_type=f32) + bc_ref[...]                    # (1, O)
    o_ref[0] = out


# ----------------------------------------------------------------------------
# wrapper
# ----------------------------------------------------------------------------
@functools.partial(jax.jit, static_argnums=2)
def attention_pool_2d(x, params, num_heads):
    x = x.astype(jnp.float32)
    B, C, H, W = x.shape
    HW = H * W
    O = params["c_proj_w"].shape[0]
    assert C % num_heads == 0
    hd = C // num_heads
    scale = hd ** -0.5

    # NCHW -> token-major (B, HW, C): pure layout glue, done once in XLA.
    tokens = x.reshape(B, C, HW).transpose(0, 2, 1)

    pos = params["pos"].astype(jnp.float32)
    pos0, poss = pos[:1], pos[1:]                              # (1, C), (HW, C)

    # bf16 weights (transposed to (in, out)), f32 biases; q-scale folded in.
    wq = (params["q_w"].T * scale).astype(jnp.bfloat16)
    bq = (params["q_b"] * scale).reshape(1, C).astype(jnp.float32)
    wk = params["k_w"].T.astype(jnp.bfloat16)
    bk = params["k_b"].reshape(1, C).astype(jnp.float32)
    wv = params["v_w"].T.astype(jnp.bfloat16)
    bv = params["v_b"].reshape(1, C).astype(jnp.float32)
    wc = params["c_proj_w"].T.astype(jnp.bfloat16)             # (C, O)
    bc = params["c_proj_b"].reshape(1, O).astype(jnp.float32)

    # 0/1 head selector: sel[d, h] = 1 iff channel d belongs to head h
    sel_f = jnp.repeat(jnp.eye(num_heads, dtype=jnp.float32), hd, axis=0)  # (C, nh)
    sel = sel_f.astype(jnp.bfloat16)
    selt = sel_f.T.astype(jnp.bfloat16)                                    # (nh, C)

    def const(shape):
        return pl.BlockSpec(shape, lambda b: (0,) * len(shape))

    out = pl.pallas_call(
        _attnpool_kernel,
        out_shape=jax.ShapeDtypeStruct((B, 1, O), jnp.float32),
        grid=(B,),
        in_specs=[
            pl.BlockSpec((1, HW, C), lambda b: (b, 0, 0)),   # spatial tokens
            const((1, C)), const((HW, C)),                   # pos[0], pos[1:]
            const((C, C)), const((1, C)),                    # wq, bq (scaled)
            const((C, C)), const((1, C)),                    # wk, bk
            const((C, C)), const((1, C)),                    # wv, bv
            const((C, num_heads)), const((num_heads, C)),    # sel, sel^T
            const((C, O)), const((1, O)),                    # wc, bc
        ],
        out_specs=pl.BlockSpec((1, 1, O), lambda b: (b, 0, 0)),
        compiler_params=pltpu.CompilerParams(
            dimension_semantics=("parallel",),
            vmem_limit_bytes=64 * 1024 * 1024),
    )(tokens, pos0, poss, wq, bq, wk, bk, wv, bv, sel, selt, wc, bc)
    return out.reshape(B, O)


# ----------------------------------------------------------------------------
# plain-JAX reference (full-precision) for correctness checking
# ----------------------------------------------------------------------------
def reference_attention_pool_2d(x, params, num_heads):
    x = x.astype(jnp.float32)
    B, C, H, W = x.shape
    HW = H * W
    hd = C // num_heads
    scale = hd ** -0.5
    t = x.reshape(B, C, HW).transpose(0, 2, 1)                      # (B, HW, C)
    xf = jnp.concatenate([t.mean(axis=1, keepdims=True), t], axis=1)
    xf = xf + params["pos"][None].astype(jnp.float32)               # (B, L, C)
    L = xf.shape[1]
    q = (xf[:, :1] @ params["q_w"].T + params["q_b"]) * scale       # (B, 1, C)
    k = xf @ params["k_w"].T + params["k_b"]
    v = xf @ params["v_w"].T + params["v_b"]
    qh = q.reshape(B, 1, num_heads, hd).transpose(0, 2, 1, 3)
    kh = k.reshape(B, L, num_heads, hd).transpose(0, 2, 1, 3)
    vh = v.reshape(B, L, num_heads, hd).transpose(0, 2, 1, 3)
    s = jnp.einsum("bhqd,bhkd->bhqk", qh, kh)
    p = jax.nn.softmax(s, axis=-1)
    o = jnp.einsum("bhqk,bhkd->bhqd", p, vh)
    o = o.transpose(0, 2, 1, 3).reshape(B, C)
    return o @ params["c_proj_w"].T + params["c_proj_b"]


# ----------------------------------------------------------------------------
# deterministic synthetic parameters (PyTorch shape conventions)
# ----------------------------------------------------------------------------
def init_params(key, spacial_dim, embed_dim, output_dim):
    L = spacial_dim ** 2 + 1
    ks = jax.random.split(key, 9)
    s = embed_dim ** -0.5
    f32 = jnp.float32
    return {
        "pos": s * jax.random.normal(ks[0], (L, embed_dim), f32),
        "q_w": s * jax.random.normal(ks[1], (embed_dim, embed_dim), f32),
        "q_b": 0.02 * jax.random.normal(ks[2], (embed_dim,), f32),
        "k_w": s * jax.random.normal(ks[3], (embed_dim, embed_dim), f32),
        "k_b": 0.02 * jax.random.normal(ks[4], (embed_dim,), f32),
        "v_w": s * jax.random.normal(ks[5], (embed_dim, embed_dim), f32),
        "v_b": 0.02 * jax.random.normal(ks[6], (embed_dim,), f32),
        "c_proj_w": s * jax.random.normal(ks[7], (output_dim, embed_dim), f32),
        "c_proj_b": 0.02 * jax.random.normal(ks[8], (output_dim,), f32),
    }


if __name__ == "__main__":
    spacial_dim = 8          # 8x8 feature map -> 65 tokens
    embed_dim = 32
    num_heads = 4
    output_dim = 16
    batch = 2

    key = jax.random.PRNGKey(0)
    kp, kx = jax.random.split(key)
    params = init_params(kp, spacial_dim, embed_dim, output_dim)
    x = jax.random.normal(kx, (batch, embed_dim, spacial_dim, spacial_dim), jnp.float32)

    out = attention_pool_2d(x, params, num_heads)
    out = jax.block_until_ready(out)

    assert out.shape == (batch, output_dim), out.shape
    assert bool(jnp.all(jnp.isfinite(out)))

    ref = reference_attention_pool_2d(x, params, num_heads)
    err = float(jnp.max(jnp.abs(out - ref)))
    assert err < 0.05, f"max abs error vs reference too large: {err}"
    print("KERNEL_OK")
</pallas_src>

<mosaic_0001>
module attributes {stable_mosaic.version = 11 : i64} {
  func.func @_attnpool_kernel(%arg0: i32, %arg1: memref<1x64x32xf32, #tpu.memory_space<vmem>>, %arg2: memref<1x32xf32, #tpu.memory_space<vmem>>, %arg3: memref<64x32xf32, #tpu.memory_space<vmem>>, %arg4: memref<32x32xbf16, #tpu.memory_space<vmem>>, %arg5: memref<1x32xf32, #tpu.memory_space<vmem>>, %arg6: memref<32x32xbf16, #tpu.memory_space<vmem>>, %arg7: memref<1x32xf32, #tpu.memory_space<vmem>>, %arg8: memref<32x32xbf16, #tpu.memory_space<vmem>>, %arg9: memref<1x32xf32, #tpu.memory_space<vmem>>, %arg10: memref<32x4xbf16, #tpu.memory_space<vmem>>, %arg11: memref<4x32xbf16, #tpu.memory_space<vmem>>, %arg12: memref<32x16xbf16, #tpu.memory_space<vmem>>, %arg13: memref<1x16xf32, #tpu.memory_space<vmem>>, %arg14: memref<1x1x16xf32, #tpu.memory_space<vmem>>) attributes {dimension_semantics = [#tpu.dimension_semantics<parallel>], iteration_bounds = array<i64: 2>, scalar_prefetch = 0 : i64, scratch_operands = 0 : i64, tpu.core_type = #tpu.core_type<tc>, window_params = [{transform_indices = @transform_0, window_bounds = array<i64: 1, 64, 32>}, {pipeline_mode = #tpu.pipeline_mode<synchronous>, transform_indices = @transform_1, window_bounds = array<i64: 1, 32>}, {pipeline_mode = #tpu.pipeline_mode<synchronous>, transform_indices = @transform_2, window_bounds = array<i64: 64, 32>}, {pipeline_mode = #tpu.pipeline_mode<synchronous>, transform_indices = @transform_3, window_bounds = array<i64: 32, 32>}, {pipeline_mode = #tpu.pipeline_mode<synchronous>, transform_indices = @transform_4, window_bounds = array<i64: 1, 32>}, {pipeline_mode = #tpu.pipeline_mode<synchronous>, transform_indices = @transform_5, window_bounds = array<i64: 32, 32>}, {pipeline_mode = #tpu.pipeline_mode<synchronous>, transform_indices = @transform_6, window_bounds = array<i64: 1, 32>}, {pipeline_mode = #tpu.pipeline_mode<synchronous>, transform_indices = @transform_7, window_bounds = array<i64: 32, 32>}, {pipeline_mode = #tpu.pipeline_mode<synchronous>, transform_indices = @transform_8, window_bounds = array<i64: 1, 32>}, {pipeline_mode = #tpu.pipeline_mode<synchronous>, transform_indices = @transform_9, window_bounds = array<i64: 32, 4>}, {pipeline_mode = #tpu.pipeline_mode<synchronous>, transform_indices = @transform_10, window_bounds = array<i64: 4, 32>}, {pipeline_mode = #tpu.pipeline_mode<synchronous>, transform_indices = @transform_11, window_bounds = array<i64: 32, 16>}, {pipeline_mode = #tpu.pipeline_mode<synchronous>, transform_indices = @transform_12, window_bounds = array<i64: 1, 16>}, {transform_indices = @transform_13, window_bounds = array<i64: 1, 1, 16>}]} {
    %c0 = arith.constant 0 : index
    %c0_0 = arith.constant 0 : index
    %c0_1 = arith.constant 0 : index
    %0 = vector.load %arg1[%c0, %c0_0, %c0_1] : memref<1x64x32xf32, #tpu.memory_space<vmem>>, vector<1x64x32xf32>
    %1 = vector.shape_cast %0 : vector<1x64x32xf32> to vector<64x32xf32>
    %cst = arith.constant dense<0.000000e+00> : vector<32xf32>
    %2 = vector.multi_reduction <add>, %1, %cst [0] : vector<64x32xf32> to vector<32xf32>
    %3 = vector.shape_cast %2 : vector<32xf32> to vector<1x32xf32>
    %cst_2 = arith.constant 6.400000e+01 : f32
    %4 = vector.broadcast %cst_2 : f32 to vector<1x32xf32>
    %5 = arith.divf %3, %4 : vector<1x32xf32>
    %c0_3 = arith.constant 0 : index
    %c0_4 = arith.constant 0 : index
    %6 = vector.load %arg2[%c0_3, %c0_4] : memref<1x32xf32, #tpu.memory_space<vmem>>, vector<1x32xf32>
    %7 = arith.addf %5, %6 : vector<1x32xf32>
    %c0_5 = arith.constant 0 : index
    %c0_6 = arith.constant 0 : index
    %8 = vector.load %arg3[%c0_5, %c0_6] : memref<64x32xf32, #tpu.memory_space<vmem>>, vector<64x32xf32>
    %9 = arith.addf %1, %8 : vector<64x32xf32>
    %10 = arith.truncf %7 : vector<1x32xf32> to vector<1x32xbf16>
    %11 = arith.truncf %9 : vector<64x32xf32> to vector<64x32xbf16>
    %c0_7 = arith.constant 0 : index
    %c0_8 = arith.constant 0 : index
    %12 = vector.load %arg4[%c0_7, %c0_8] : memref<32x32xbf16, #tpu.memory_space<vmem>>, vector<32x32xbf16>
    %cst_9 = arith.constant dense<0.000000e+00> : vector<1x32xf32>
    %13 = tpu.matmul %10, %12, %cst_9 {dimension_numbers = #tpu.dot_dimension_numbers<[1], [0], [0], [1], [0, 0, 1, 1], [], []>} : vector<1x32xbf16>, vector<32x32xbf16>, vector<1x32xf32> -> vector<1x32xf32>
    %c0_10 = arith.constant 0 : index
    %c0_11 = arith.constant 0 : index
    %14 = vector.load %arg5[%c0_10, %c0_11] : memref<1x32xf32, #tpu.memory_space<vmem>>, vector<1x32xf32>
    %15 = arith.addf %13, %14 : vector<1x32xf32>
    %c0_12 = arith.constant 0 : index
    %c0_13 = arith.constant 0 : index
    %16 = vector.load %arg6[%c0_12, %c0_13] : memref<32x32xbf16, #tpu.memory_space<vmem>>, vector<32x32xbf16>
    %cst_14 = arith.constant dense<0.000000e+00> : vector<1x32xf32>
    %17 = tpu.matmul %10, %16, %cst_14 {dimension_numbers = #tpu.dot_dimension_numbers<[1], [0], [0], [1], [0, 0, 1, 1], [], []>} : vector<1x32xbf16>, vector<32x32xbf16>, vector<1x32xf32> -> vector<1x32xf32>
    %c0_15 = arith.constant 0 : index
    %c0_16 = arith.constant 0 : index
    %18 = vector.load %arg7[%c0_15, %c0_16] : memref<1x32xf32, #tpu.memory_space<vmem>>, vector<1x32xf32>
    %19 = arith.addf %17, %18 : vector<1x32xf32>
    %c0_17 = arith.constant 0 : index
    %c0_18 = arith.constant 0 : index
    %20 = vector.load %arg6[%c0_17, %c0_18] : memref<32x32xbf16, #tpu.memory_space<vmem>>, vector<32x32xbf16>
    %cst_19 = arith.constant dense<0.000000e+00> : vector<64x32xf32>
    %21 = tpu.matmul %11, %20, %cst_19 {dimension_numbers = #tpu.dot_dimension_numbers<[1], [0], [0], [1], [0, 0, 1, 1], [], []>} : vector<64x32xbf16>, vector<32x32xbf16>, vector<64x32xf32> -> vector<64x32xf32>
    %c0_20 = arith.constant 0 : index
    %c0_21 = arith.constant 0 : index
    %22 = vector.load %arg7[%c0_20, %c0_21] : memref<1x32xf32, #tpu.memory_space<vmem>>, vector<1x32xf32>
    %23 = vector.broadcast %22 : vector<1x32xf32> to vector<64x32xf32>
    %24 = arith.addf %21, %23 : vector<64x32xf32>
    %c0_22 = arith.constant 0 : index
    %c0_23 = arith.constant 0 : index
    %25 = vector.load %arg8[%c0_22, %c0_23] : memref<32x32xbf16, #tpu.memory_space<vmem>>, vector<32x32xbf16>
    %cst_24 = arith.constant dense<0.000000e+00> : vector<1x32xf32>
    %26 = tpu.matmul %10, %25, %cst_24 {dimension_numbers = #tpu.dot_dimension_numbers<[1], [0], [0], [1], [0, 0, 1, 1], [], []>} : vector<1x32xbf16>, vector<32x32xbf16>, vector<1x32xf32> -> vector<1x32xf32>
    %c0_25 = arith.constant 0 : index
    %c0_26 = arith.constant 0 : index
    %27 = vector.load %arg9[%c0_25, %c0_26] : memref<1x32xf32, #tpu.memory_space<vmem>>, vector<1x32xf32>
    %28 = arith.addf %26, %27 : vector<1x32xf32>
    %c0_27 = arith.constant 0 : index
    %c0_28 = arith.constant 0 : index
    %29 = vector.load %arg8[%c0_27, %c0_28] : memref<32x32xbf16, #tpu.memory_space<vmem>>, vector<32x32xbf16>
    %cst_29 = arith.constant dense<0.000000e+00> : vector<64x32xf32>
    %30 = tpu.matmul %11, %29, %cst_29 {dimension_numbers = #tpu.dot_dimension_numbers<[1], [0], [0], [1], [0, 0, 1, 1], [], []>} : vector<64x32xbf16>, vector<32x32xbf16>, vector<64x32xf32> -> vector<64x32xf32>
    %c0_30 = arith.constant 0 : index
    %c0_31 = arith.constant 0 : index
    %31 = vector.load %arg9[%c0_30, %c0_31] : memref<1x32xf32, #tpu.memory_space<vmem>>, vector<1x32xf32>
    %32 = vector.broadcast %31 : vector<1x32xf32> to vector<64x32xf32>
    %33 = arith.addf %30, %32 : vector<64x32xf32>
    %34 = arith.mulf %19, %15 : vector<1x32xf32>
    %35 = arith.truncf %34 : vector<1x32xf32> to vector<1x32xbf16>
    %c0_32 = arith.constant 0 : index
    %c0_33 = arith.constant 0 : index
    %36 = vector.load %arg10[%c0_32, %c0_33] : memref<32x4xbf16, #tpu.memory_space<vmem>>, vector<32x4xbf16>
    %cst_34 = arith.constant dense<0.000000e+00> : vector<1x4xf32>
    %37 = tpu.matmul %35, %36, %cst_34 {dimension_numbers = #tpu.dot_dimension_numbers<[1], [0], [0], [1], [0, 0, 1, 1], [], []>} : vector<1x32xbf16>, vector<32x4xbf16>, vector<1x4xf32> -> vector<1x4xf32>
    %38 = vector.broadcast %15 : vector<1x32xf32> to vector<64x32xf32>
    %39 = arith.mulf %24, %38 : vector<64x32xf32>
    %40 = arith.truncf %39 : vector<64x32xf32> to vector<64x32xbf16>
    %c0_35 = arith.constant 0 : index
    %c0_36 = arith.constant 0 : index
    %41 = vector.load %arg10[%c0_35, %c0_36] : memref<32x4xbf16, #tpu.memory_space<vmem>>, vector<32x4xbf16>
    %cst_37 = arith.constant dense<0.000000e+00> : vector<64x4xf32>
    %42 = tpu.matmul %40, %41, %cst_37 {dimension_numbers = #tpu.dot_dimension_numbers<[1], [0], [0], [1], [0, 0, 1, 1], [], []>} : vector<64x32xbf16>, vector<32x4xbf16>, vector<64x4xf32> -> vector<64x4xf32>
    %cst_38 = arith.constant dense<0xFF800000> : vector<4xf32>
    %43 = vector.multi_reduction <maximumf>, %42, %cst_38 [0] : vector<64x4xf32> to vector<4xf32>
    %44 = vector.shape_cast %43 : vector<4xf32> to vector<1x4xf32>
    %45 = arith.maximumf %37, %44 : vector<1x4xf32>
    %46 = arith.subf %37, %45 : vector<1x4xf32>
    %47 = math.exp %46 : vector<1x4xf32>
    %48 = vector.broadcast %45 : vector<1x4xf32> to vector<64x4xf32>
    %49 = arith.subf %42, %48 : vector<64x4xf32>
    %50 = math.exp %49 : vector<64x4xf32>
    %cst_39 = arith.constant dense<0.000000e+00> : vector<4xf32>
    %51 = vector.multi_reduction <add>, %50, %cst_39 [0] : vector<64x4xf32> to vector<4xf32>
    %52 = vector.shape_cast %51 : vector<4xf32> to vector<1x4xf32>
    %53 = arith.addf %47, %52 : vector<1x4xf32>
    %54 = tpu.reciprocal %53 {approx = true} : vector<1x4xf32> -> vector<1x4xf32>
    %55 = arith.mulf %47, %54 : vector<1x4xf32>
    %56 = vector.broadcast %54 : vector<1x4xf32> to vector<64x4xf32>
    %57 = arith.mulf %50, %56 : vector<64x4xf32>
    %58 = arith.truncf %55 : vector<1x4xf32> to vector<1x4xbf16>
    %c0_40 = arith.constant 0 : index
    %c0_41 = arith.constant 0 : index
    %59 = vector.load %arg11[%c0_40, %c0_41] : memref<4x32xbf16, #tpu.memory_space<vmem>>, vector<4x32xbf16>
    %cst_42 = arith.constant dense<0.000000e+00> : vector<1x32xf32>
    %60 = tpu.matmul %58, %59, %cst_42 {dimension_numbers = #tpu.dot_dimension_numbers<[1], [0], [0], [1], [0, 0, 1, 1], [], []>} : vector<1x4xbf16>, vector<4x32xbf16>, vector<1x32xf32> -> vector<1x32xf32>
    %61 = arith.truncf %57 : vector<64x4xf32> to vector<64x4xbf16>
    %c0_43 = arith.constant 0 : index
    %c0_44 = arith.constant 0 : index
    %62 = vector.load %arg11[%c0_43, %c0_44] : memref<4x32xbf16, #tpu.memory_space<vmem>>, vector<4x32xbf16>
    %cst_45 = arith.constant dense<0.000000e+00> : vector<64x32xf32>
    %63 = tpu.matmul %61, %62, %cst_45 {dimension_numbers = #tpu.dot_dimension_numbers<[1], [0], [0], [1], [0, 0, 1, 1], [], []>} : vector<64x4xbf16>, vector<4x32xbf16>, vector<64x32xf32> -> vector<64x32xf32>
    %64 = arith.mulf %60, %28 : vector<1x32xf32>
    %65 = arith.mulf %63, %33 : vector<64x32xf32>
    %cst_46 = arith.constant dense<0.000000e+00> : vector<32xf32>
    %66 = vector.multi_reduction <add>, %65, %cst_46 [0] : vector<64x32xf32> to vector<32xf32>
    %67 = vector.shape_cast %66 : vector<32xf32> to vector<1x32xf32>
    %68 = arith.addf %64, %67 : vector<1x32xf32>
    %69 = arith.truncf %68 : vector<1x32xf32> to vector<1x32xbf16>
    %c0_47 = arith.constant 0 : index
    %c0_48 = arith.constant 0 : index
    %70 = vector.load %arg12[%c0_47, %c0_48] : memref<32x16xbf16, #tpu.memory_space<vmem>>, vector<32x16xbf16>
    %cst_49 = arith.constant dense<0.000000e+00> : vector<1x16xf32>
    %71 = tpu.matmul %69, %70, %cst_49 {dimension_numbers = #tpu.dot_dimension_numbers<[1], [0], [0], [1], [0, 0, 1, 1], [], []>} : vector<1x32xbf16>, vector<32x16xbf16>, vector<1x16xf32> -> vector<1x16xf32>
    %c0_50 = arith.constant 0 : index
    %c0_51 = arith.constant 0 : index
    %72 = vector.load %arg13[%c0_50, %c0_51] : memref<1x16xf32, #tpu.memory_space<vmem>>, vector<1x16xf32>
    %73 = arith.addf %71, %72 : vector<1x16xf32>
    %c0_52 = arith.constant 0 : index
    %c0_53 = arith.constant 0 : index
    %c0_54 = arith.constant 0 : index
    %74 = vector.load %arg14[%c0_52, %c0_53, %c0_54] : memref<1x1x16xf32, #tpu.memory_space<vmem>>, vector<1x1x16xf32>
    %75 = vector.shape_cast %74 : vector<1x1x16xf32> to vector<1x16xf32>
    %76 = vector.shape_cast %73 : vector<1x16xf32> to vector<1x1x16xf32>
    tpu.vector_store %arg14[%c0_52, %c0_53, %c0_54], %76 {strides = array<i32>} : memref<1x1x16xf32, #tpu.memory_space<vmem>>, vector<1x1x16xf32>,
    return
  }
  func.func @transform_0(%arg0: i32) -> (i32, i32, i32) {
    %c0_i32 = arith.constant 0 : i32
    %c0_i32_0 = arith.constant 0 : i32
    %c0_i32_1 = arith.constant 0 : i32
    return %arg0, %c0_i32, %c0_i32_0 : i32, i32, i32
  }
  func.func @transform_1(%arg0: i32) -> (i32, i32) {
    %c0_i32 = arith.constant 0 : i32
    %c0_i32_0 = arith.constant 0 : i32
    %c0_i32_1 = arith.constant 0 : i32
    return %c0_i32, %c0_i32_0 : i32, i32
  }
  func.func @transform_2(%arg0: i32) -> (i32, i32) {
    %c0_i32 = arith.constant 0 : i32
    %c0_i32_0 = arith.constant 0 : i32
    %c0_i32_1 = arith.constant 0 : i32
    return %c0_i32, %c0_i32_0 : i32, i32
  }
  func.func @transform_3(%arg0: i32) -> (i32, i32) {
    %c0_i32 = arith.constant 0 : i32
    %c0_i32_0 = arith.constant 0 : i32
    %c0_i32_1 = arith.constant 0 : i32
    return %c0_i32, %c0_i32_0 : i32, i32
  }
  func.func @transform_4(%arg0: i32) -> (i32, i32) {
    %c0_i32 = arith.constant 0 : i32
    %c0_i32_0 = arith.constant 0 : i32
    %c0_i32_1 = arith.constant 0 : i32
    return %c0_i32, %c0_i32_0 : i32, i32
  }
  func.func @transform_5(%arg0: i32) -> (i32, i32) {
    %c0_i32 = arith.constant 0 : i32
    %c0_i32_0 = arith.constant 0 : i32
    %c0_i32_1 = arith.constant 0 : i32
    return %c0_i32, %c0_i32_0 : i32, i32
  }
  func.func @transform_6(%arg0: i32) -> (i32, i32) {
    %c0_i32 = arith.constant 0 : i32
    %c0_i32_0 = arith.constant 0 : i32
    %c0_i32_1 = arith.constant 0 : i32
    return %c0_i32, %c0_i32_0 : i32, i32
  }
  func.func @transform_7(%arg0: i32) -> (i32, i32) {
    %c0_i32 = arith.constant 0 : i32
    %c0_i32_0 = arith.constant 0 : i32
    %c0_i32_1 = arith.constant 0 : i32
    return %c0_i32, %c0_i32_0 : i32, i32
  }
  func.func @transform_8(%arg0: i32) -> (i32, i32) {
    %c0_i32 = arith.constant 0 : i32
    %c0_i32_0 = arith.constant 0 : i32
    %c0_i32_1 = arith.constant 0 : i32
    return %c0_i32, %c0_i32_0 : i32, i32
  }
  func.func @transform_9(%arg0: i32) -> (i32, i32) {
    %c0_i32 = arith.constant 0 : i32
    %c0_i32_0 = arith.constant 0 : i32
    %c0_i32_1 = arith.constant 0 : i32
    return %c0_i32, %c0_i32_0 : i32, i32
  }
  func.func @transform_10(%arg0: i32) -> (i32, i32) {
    %c0_i32 = arith.constant 0 : i32
    %c0_i32_0 = arith.constant 0 : i32
    %c0_i32_1 = arith.constant 0 : i32
    return %c0_i32, %c0_i32_0 : i32, i32
  }
  func.func @transform_11(%arg0: i32) -> (i32, i32) {
    %c0_i32 = arith.constant 0 : i32
    %c0_i32_0 = arith.constant 0 : i32
    %c0_i32_1 = arith.constant 0 : i32
    return %c0_i32, %c0_i32_0 : i32, i32
  }
  func.func @transform_12(%arg0: i32) -> (i32, i32) {
    %c0_i32 = arith.constant 0 : i32
    %c0_i32_0 = arith.constant 0 : i32
    %c0_i32_1 = arith.constant 0 : i32
    return %c0_i32, %c0_i32_0 : i32, i32
  }
  func.func @transform_13(%arg0: i32) -> (i32, i32, i32) {
    %c0_i32 = arith.constant 0 : i32
    %c0_i32_0 = arith.constant 0 : i32
    %c0_i32_1 = arith.constant 0 : i32
    return %arg0, %c0_i32, %c0_i32_0 : i32, i32, i32
  }
}

</mosaic_0001>

<bundles_post_ra>
// kernel: attention_pool_2d.1
= control target key start
LH: loop header
LB: loop body
LE: loop exit
PB: predicated region body
PF: predicated region fallthrough
CT: control target
= control target key end

     0   :  { %s3206_s0 = inlined_call_operand.hbm [shape: f32[2,64,32], index: 0, kind: input, shape index: {}]   ;;  %s3207_s1 = inlined_call_operand.hbm [shape: f32[1,32], index: 1, kind: input, shape index: {}]   ;;  %s3208_s2 = inlined_call_operand.hbm [shape: f32[64,32], index: 2, kind: input, shape index: {}]   ;;  %s3209_s3 = inlined_call_operand.hbm [shape: bf16[32,32], index: 3, kind: input, shape index: {}]   ;;  %s3210_s4 = inlined_call_operand.hbm [shape: f32[1,32], index: 4, kind: input, shape index: {}]   ;;  %s3211_s5 = inlined_call_operand.hbm [shape: bf16[32,32], index: 5, kind: input, shape index: {}]   ;;  %s3212_s6 = inlined_call_operand.hbm [shape: f32[1,32], index: 6, kind: input, shape index: {}]   ;;  %s3213_s7 = inlined_call_operand.hbm [shape: bf16[32,32], index: 7, kind: input, shape index: {}]   ;;  %s3214_s8 = inlined_call_operand.hbm [shape: f32[1,32], index: 8, kind: input, shape index: {}]   ;;  %s3215_s9 = inlined_call_operand.hbm [shape: bf16[32,4], index: 9, kind: input, shape index: {}]   ;;  %s3216_s10 = inlined_call_operand.hbm [shape: bf16[4,32], index: 10, kind: input, shape index: {}]   ;;  %s3217_s11 = inlined_call_operand.hbm [shape: bf16[32,16], index: 11, kind: input, shape index: {}]   ;;  %s3218_s12 = inlined_call_operand.hbm [shape: f32[1,16], index: 12, kind: input, shape index: {}]   ;;  %s3219_s13 = inlined_call_operand.hbm [shape: f32[2,1,16], index: 13, kind: output, shape index: {}]  }
   0x1   :  { %3230 = sst [smem:[#allocation34_spill]] %s3206_s0 }
   0x2   :  { %3231 = sst [smem:[#allocation35_spill]] %s3207_s1 }
   0x3   :  { %3232 = sst [smem:[#allocation36_spill]] %s3209_s3 }
   0x4   :  { %3233 = sst [smem:[#allocation37_spill]] %s3211_s5 }
   0x5   :  { %3234 = sst [smem:[#allocation38_spill]] %s3219_s13 }
   0x6   :  { %18 = vsyncpa [#allocation3], 0 }
   0x7   :  { %20 = vsyncpa [#allocation3 + $0x1], 0 }
   0x8   :  { %21 = vsyncpa [#allocation6], 0 }
   0x9   :  { %22 = vsyncpa [#allocation9], 0 }
   0xa   :  { %23 = vsyncpa [#allocation12], 0 }
   0xb   :  { %24 = vsyncpa [#allocation15], 0 }
   0xc   :  { %25 = vsyncpa [#allocation18], 0 }
   0xd   :  { %26 = vsyncpa [#allocation21], 0 }
   0xe   :  { %27 = vsyncpa [#allocation4], 0 }
   0xf   :  { %29 = vsyncpa [#allocation4 + $0x1], 0  ;;  %s2617_s25 = smov 0   ;;  %s2619_s26 = smov 0  }
  0x10   :  { %s2621_s27 = smov 0   ;;  %s2623_s28 = smov 0  }
  0x11 LB: > { %s2527_s29 = smov [#allocation5]   ;;  %s2638_s14 = sadd.s32 4294967295, %s2525_s28   ;;  %s2525_s28 = sphi %s2623_s28, %s3274_s28   ;;  %s2521_s27 = sphi %s2621_s27, %s3273_s27   ;;  %s2517_s26 = sphi %s2619_s26, %s3272_s26   ;;  %s2513_s25 = sphi %s2617_s25, %s3271_s25  }
  0x12   : > { %s357_s30 = sshll.u32 %s2527_s29, 4  ;;  %3235 = sst [smem:[#allocation32_spill]] %s2638_s14  ;;  %s2643_s30 = int_to_ptr.vmem [resolvable:$true] %s357_s30 }
  0x13   : > { %p1666_p0 = scmp.ge.s32.totalorder %s2525_s28, 1  ;;  %p3226_p1 = scmp.eq.s32.totalorder %s2638_s14, 0 }
  0x14   : > { %p344_p2 = scmp.lt.s32.totalorder %s2525_s28, 3  ;;  %s2528_s16 = smov [#allocation8]  }
  0x15   : > { %s380_s17 = sshll.u32 %s2528_s16, 4  ;;  %s2529_s19 = smov [#allocation11]   ;;  %s2652_s17 = int_to_ptr.vmem [resolvable:$true] %s380_s17 }
  0x16   : > { %p2645_p3 = pnand %p1666_p0, %p344_p2  ;;  %s404_s20 = sshll.u32 %s2529_s19, 4  ;;  %s2660_s20 = int_to_ptr.vmem [resolvable:$true] %s404_s20 }
  0x17   : > { %s3239_s1 = sld [smem:[#allocation35_spill]] }
  0x18   : > { %s3236_s15 = scalar_select %p2645_p3, 1, 0 }
  0x19   : > { %p1918_p5 = pneg %p2645_p3 }
  0x1a   : > { %3237 = sst [smem:[#allocation33_spill]] %s3236_s15 }
  0x1b   : > { %p2656_p6 = pnand %p1918_p5, %p3226_p1 }
  0x1d   : > { %s2069_s23 = scalar_lea.hbm %s3239_s1, 16  ;;  %p2670_p8 = pneg %p2656_p6 }
  0x1e   : > { %p2070_p7 = scmp.ne.s32.totalorder %s3239_s1, %s2069_s23  ;;  %p2076_p11 = scmp.lt.u32.totalorder %s2069_s23, %s3239_s1 }
  0x20   : > { %p2072_p9 = pnand %p2670_p8, %p2070_p7 }
  0x22   : > { %p2073_p10 = pneg %p2072_p9 }
  0x24   : > { %p2078_p12 = pnand %p2076_p11, %p2073_p10 }
  0x26   : > { %2081 = shalt.err (!%p2078_p12)
}
  0x27   : > { %s2082_s21 = scalar_lea.vmem %s2643_s30, 16  ;;  %s2089_s22 = scalar_lea.vmem %s2643_s30, 32 }
  0x28   : > { %p2083_p13 = scmp.ne.s32.totalorder %s2643_s30, %s2082_s21  ;;  %p2090_p5 = scmp.lt.s32.totalorder %s2643_s30, %s2643_s30 }
  0x29   : > { %p2091_p7 = scmp.lt.s32.totalorder %s2089_s22, %s2082_s21 }
  0x2a   : > { %p2085_p0 = pnand %p2083_p13, %p2670_p8 }
  0x2b   : > { %p2092_p9 = por %p2091_p7, %p2090_p5 }
  0x2c   : > { %p2086_p2 = pneg %p2085_p0 }
  0x2e   : > { %p2093_p4 = pnand %p2092_p9, %p2086_p2 }
  0x30   : > { %2096 = shalt.err (!%p2093_p4)
}
  0x31   : > { %1921 = dma.hbm_to_vmem [thread:$0]  (!%p2656_p6), %s3239_s1, 16, %s2643_s30, [#allocation6]  }
  0x32   : > { %s3241_s3 = sld [smem:[#allocation36_spill]] }
  0x38   : > { %s2097_s19 = scalar_lea.hbm %s3241_s3, 256 }
  0x39   : > { %p2098_p10 = scmp.ne.s32.totalorder %s3241_s3, %s2097_s19  ;;  %p2104_p4 = scmp.lt.u32.totalorder %s2097_s19, %s3241_s3 }
  0x3b   : > { %p2100_p11 = pnand %p2098_p10, %p2670_p8 }
  0x3d   : > { %p2101_p12 = pneg %p2100_p11 }
  0x3f   : > { %p2106_p13 = pnand %p2104_p4, %p2101_p12 }
  0x41   : > { %2109 = shalt.err (!%p2106_p13)
}
  0x42   : > { %s2110_s30 = scalar_lea.vmem %s2652_s17, 256  ;;  %p2118_p7 = scmp.lt.s32.totalorder %s2652_s17, %s2652_s17 }
  0x43   : > { %p2111_p0 = scmp.ne.s32.totalorder %s2652_s17, %s2110_s30  ;;  %p2119_p9 = scmp.lt.s32.totalorder %s2110_s30, %s2110_s30 }
  0x45   : > { %p2113_p2 = pnand %p2111_p0, %p2670_p8  ;;  %p2120_p10 = por %p2119_p9, %p2118_p7 }
  0x47   : > { %p2114_p5 = pneg %p2113_p2 }
  0x49   : > { %p2121_p11 = pnand %p2120_p10, %p2114_p5 }
  0x4b   : > { %2124 = shalt.err (!%p2121_p11)
}
  0x4c   : > { %s2530_s0 = smov 64   ;;  %s2531_s15 = smov 4  }
  0x4d   : > { %1927 = dma.hbm_to_vmem [thread:$0]  (!%p2656_p6), %s3241_s3, 256, %s2652_s17, [#allocation9], %s2530_s0, %s2530_s0, %s2531_s15  }
  0x4e   : > { %s3242_s5 = sld [smem:[#allocation37_spill]] }
  0x54   : > { %s2125_s19 = scalar_lea.hbm %s3242_s5, 256 }
  0x55   : > { %p2126_p12 = scmp.ne.s32.totalorder %s3242_s5, %s2125_s19  ;;  %p2132_p0 = scmp.lt.u32.totalorder %s2125_s19, %s3242_s5 }
  0x57   : > { %p2128_p4 = pnand %p2126_p12, %p2670_p8 }
  0x59   : > { %p2129_p13 = pneg %p2128_p4 }
  0x5b   : > { %p2134_p2 = pnand %p2132_p0, %p2129_p13 }
  0x5d   : > { %2137 = shalt.err (!%p2134_p2)
}
  0x5e   : > { %s2138_s17 = scalar_lea.vmem %s2660_s20, 256  ;;  %p2146_p10 = scmp.lt.s32.totalorder %s2660_s20, %s2660_s20 }
  0x5f   : > { %p2139_p5 = scmp.ne.s32.totalorder %s2660_s20, %s2138_s17  ;;  %p2147_p11 = scmp.lt.s32.totalorder %s2138_s17, %s2138_s17 }
  0x61   : > { %p2141_p7 = pnand %p2139_p5, %p2670_p8  ;;  %p2148_p12 = por %p2147_p11, %p2146_p10 }
  0x63   : > { %p2142_p9 = pneg %p2141_p7 }
  0x65   : > { %p2149_p4 = pnand %p2148_p12, %p2142_p9 }
  0x67   : > { %2152 = shalt.err (!%p2149_p4)
}
  0x68   : > { %1933 = dma.hbm_to_vmem [thread:$0]  (!%p2656_p6), %s3242_s5, 256, %s2660_s20, [#allocation12], %s2530_s0, %s2530_s0, %s2531_s15  }
  0x69   : > { %s2532_s23 = smov [#allocation14]   ;;  %s2533_s29 = smov [#allocation17]  }
  0x6a   : > { %s428_s24 = sshll.u32 %s2532_s23, 4  ;;  %s452_s19 = sshll.u32 %s2533_s29, 4  ;;  %s429_s24 = int_to_ptr.vmem [resolvable:$true] %s428_s24  ;;  %s453_s19 = int_to_ptr.vmem [resolvable:$true] %s452_s19 }
  0x6b   : > { %s2153_s30 = scalar_lea.hbm %s3213_s7, 256 }
  0x6c   : > { %p2154_p13 = scmp.ne.s32.totalorder %s3213_s7, %s2153_s30  ;;  %p2160_p5 = scmp.lt.u32.totalorder %s2153_s30, %s3213_s7 }
  0x6e   : > { %p2156_p0 = pnand %p2154_p13, %p2670_p8 }
  0x70   : > { %p2157_p2 = pneg %p2156_p0 }
  0x72   : > { %p2162_p7 = pnand %p2160_p5, %p2157_p2 }
  0x74   : > { %2165 = shalt.err (!%p2162_p7)
}
  0x75   : > { %s2166_s20 = scalar_lea.vmem %s429_s24, 256  ;;  %p2174_p12 = scmp.lt.s32.totalorder %s429_s24, %s429_s24 }
  0x76   : > { %p2167_p9 = scmp.ne.s32.totalorder %s429_s24, %s2166_s20  ;;  %p2175_p4 = scmp.lt.s32.totalorder %s2166_s20, %s2166_s20 }
  0x78   : > { %p2169_p10 = pnand %p2167_p9, %p2670_p8  ;;  %p2176_p1 = por %p2175_p4, %p2174_p12 }
  0x7a   : > { %p2170_p11 = pneg %p2169_p10 }
  0x7c   : > { %p2177_p3 = pnand %p2176_p1, %p2170_p11 }
  0x7e   : > { %2180 = shalt.err (!%p2177_p3)
}
  0x7f   : > { %1939 = dma.hbm_to_vmem [thread:$0]  (!%p2656_p6), %s3213_s7, 256, %s429_s24, [#allocation15], %s2530_s0, %s2530_s0, %s2531_s15  }
  0x80   : > { %s2181_s29 = scalar_lea.hbm %s3215_s9, 256 }
  0x81   : > { %p2182_p1 = scmp.ne.s32.totalorder %s3215_s9, %s2181_s29  ;;  %p2188_p0 = scmp.lt.u32.totalorder %s2181_s29, %s3215_s9 }
  0x83   : > { %p2184_p3 = pnand %p2182_p1, %p2670_p8 }
  0x85   : > { %p2185_p13 = pneg %p2184_p3 }
  0x87   : > { %p2190_p2 = pnand %p2188_p0, %p2185_p13 }
  0x89   : > { %2193 = shalt.err (!%p2190_p2)
}
  0x8a   : > { %s2194_s1 = scalar_lea.vmem %s453_s19, 256  ;;  %p2202_p10 = scmp.lt.s32.totalorder %s453_s19, %s453_s19 }
  0x8b   : > { %p2195_p5 = scmp.ne.s32.totalorder %s453_s19, %s2194_s1  ;;  %p2203_p11 = scmp.lt.s32.totalorder %s2194_s1, %s2194_s1 }
  0x8d   : > { %p2197_p7 = pnand %p2195_p5, %p2670_p8  ;;  %p2204_p12 = por %p2203_p11, %p2202_p10 }
  0x8f   : > { %p2198_p9 = pneg %p2197_p7 }
  0x91   : > { %p2205_p4 = pnand %p2204_p12, %p2198_p9 }
  0x93   : > { %2208 = shalt.err (!%p2205_p4)
}
  0x94   : > { %1945 = dma.hbm_to_vmem [thread:$0]  (!%p2656_p6), %s3215_s9, 256, %s453_s19, [#allocation18], %s2530_s0, %s2530_s0, %s2531_s15  }
  0x95   : > { %s2534_s3 = smov [#allocation20]   ;;  %s2535_s13 = smov [#allocation7]  }
  0x96   : > { %s476_s14 = sshll.u32 %s2534_s3, 4  ;;  %s367_s23 = sshll.u32 %s2535_s13, 4  ;;  %s477_s14 = int_to_ptr.vmem [resolvable:$true] %s476_s14  ;;  %s368_s23 = int_to_ptr.vmem [resolvable:$true] %s367_s23 }
  0x97   : > { %s2209_s22 = scalar_lea.hbm %s3217_s11, 256 }
  0x98   : > { %p2210_p1 = scmp.ne.s32.totalorder %s3217_s11, %s2209_s22  ;;  %p2216_p0 = scmp.lt.u32.totalorder %s2209_s22, %s3217_s11 }
  0x9a   : > { %p2212_p3 = pnand %p2210_p1, %p2670_p8 }
  0x9c   : > { %p2213_p13 = pneg %p2212_p3 }
  0x9e   : > { %p2218_p2 = pnand %p2216_p0, %p2213_p13 }
  0xa0   : > { %2221 = shalt.err (!%p2218_p2)
}
  0xa1   : > { %s2222_s19 = scalar_lea.vmem %s477_s14, 256  ;;  %p2230_p10 = scmp.lt.s32.totalorder %s477_s14, %s477_s14 }
  0xa2   : > { %p2223_p5 = scmp.ne.s32.totalorder %s477_s14, %s2222_s19  ;;  %p2231_p11 = scmp.lt.s32.totalorder %s2222_s19, %s2222_s19 }
  0xa4   : > { %p2225_p7 = pnand %p2223_p5, %p2670_p8  ;;  %p2232_p12 = por %p2231_p11, %p2230_p10 }
  0xa6   : > { %p2226_p9 = pneg %p2225_p7 }
  0xa8   : > { %p2233_p4 = pnand %p2232_p12, %p2226_p9 }
  0xaa   : > { %2236 = shalt.err (!%p2233_p4)
}
  0xab   : > { %1951 = dma.hbm_to_vmem [thread:$0]  (!%p2656_p6), %s3217_s11, 256, %s477_s14, [#allocation21], %s2530_s0, %s2530_s0, %s2531_s15  }
  0xac   : > { %s2237_s21 = scalar_lea.hbm %s3208_s2, 1024 }
  0xad   : > { %p2238_p1 = scmp.ne.s32.totalorder %s3208_s2, %s2237_s21  ;;  %p2244_p0 = scmp.lt.u32.totalorder %s2237_s21, %s3208_s2 }
  0xaf   : > { %p2240_p3 = pnand %p2238_p1, %p2670_p8 }
  0xb1   : > { %p2241_p13 = pneg %p2240_p3 }
  0xb3   : > { %p2246_p2 = pnand %p2244_p0, %p2241_p13 }
  0xb5   : > { %2249 = shalt.err (!%p2246_p2)
}
  0xb6   : > { %s2250_s24 = scalar_lea.vmem %s368_s23, 1024  ;;  %p2258_p10 = scmp.lt.s32.totalorder %s368_s23, %s368_s23 }
  0xb7   : > { %p2251_p5 = scmp.ne.s32.totalorder %s368_s23, %s2250_s24  ;;  %p2259_p11 = scmp.lt.s32.totalorder %s2250_s24, %s2250_s24 }
  0xb9   : > { %p2253_p7 = pnand %p2251_p5, %p2670_p8  ;;  %p2260_p12 = por %p2259_p11, %p2258_p10 }
  0xbb   : > { %p2254_p9 = pneg %p2253_p7 }
  0xbd   : > { %p2261_p4 = pnand %p2260_p12, %p2254_p9 }
  0xbf   : > { %2264 = shalt.err (!%p2261_p4)
}
  0xc0   : > { %s3228_s0 = smov 128   ;;  %s2537_s15 = smov 8  }
  0xc1   : > { %1924 = dma.hbm_to_vmem [thread:$0]  (!%p2656_p6), %s3208_s2, 1024, %s368_s23, [#allocation6], %s3228_s0, %s3228_s0, %s2537_s15  }
  0xc2   : > { %s2538_s20 = smov [#allocation10]   ;;  %s2539_s13 = smov [#allocation13]  }
  0xc3   : > { %s394_s3 = sshll.u32 %s2538_s20, 4  ;;  %s418_s29 = sshll.u32 %s2539_s13, 4  ;;  %s395_s3 = int_to_ptr.vmem [resolvable:$true] %s394_s3  ;;  %s419_s29 = int_to_ptr.vmem [resolvable:$true] %s418_s29 }
  0xc4   : > { %s2265_s30 = scalar_lea.hbm %s3210_s4, 16 }
  0xc5   : > { %p2266_p1 = scmp.ne.s32.totalorder %s3210_s4, %s2265_s30  ;;  %p2272_p0 = scmp.lt.u32.totalorder %s2265_s30, %s3210_s4 }
  0xc7   : > { %p2268_p3 = pnand %p2266_p1, %p2670_p8 }
  0xc9   : > { %p2269_p13 = pneg %p2268_p3 }
  0xcb   : > { %p2274_p2 = pnand %p2272_p0, %p2269_p13 }
  0xcd   : > { %2277 = shalt.err (!%p2274_p2)
}
  0xce   : > { %s2278_s23 = scalar_lea.vmem %s395_s3, 16  ;;  %s2285_s14 = scalar_lea.vmem %s395_s3, 32 }
  0xcf   : > { %p2279_p5 = scmp.ne.s32.totalorder %s395_s3, %s2278_s23  ;;  %p2286_p10 = scmp.lt.s32.totalorder %s395_s3, %s395_s3 }
  0xd0   : > { %p2287_p11 = scmp.lt.s32.totalorder %s2285_s14, %s2278_s23 }
  0xd1   : > { %p2281_p7 = pnand %p2279_p5, %p2670_p8 }
  0xd2   : > { %p2288_p12 = por %p2287_p11, %p2286_p10 }
  0xd3   : > { %p2282_p9 = pneg %p2281_p7 }
  0xd5   : > { %p2289_p4 = pnand %p2288_p12, %p2282_p9 }
  0xd7   : > { %2292 = shalt.err (!%p2289_p4)
}
  0xd8   : > { %1930 = dma.hbm_to_vmem [thread:$0]  (!%p2656_p6), %s3210_s4, 16, %s395_s3, [#allocation9]  }
  0xd9   : > { %s2293_s21 = scalar_lea.hbm %s3212_s6, 16 }
  0xda   : > { %p2294_p1 = scmp.ne.s32.totalorder %s3212_s6, %s2293_s21  ;;  %p2300_p0 = scmp.lt.u32.totalorder %s2293_s21, %s3212_s6 }
  0xdc   : > { %p2296_p3 = pnand %p2294_p1, %p2670_p8 }
  0xde   : > { %p2297_p13 = pneg %p2296_p3 }
  0xe0   : > { %p2302_p2 = pnand %p2300_p0, %p2297_p13 }
  0xe2   : > { %2305 = shalt.err (!%p2302_p2)
}
  0xe3   : > { %s2306_s24 = scalar_lea.vmem %s419_s29, 16  ;;  %s2313_s3 = scalar_lea.vmem %s419_s29, 32 }
  0xe4   : > { %p2307_p5 = scmp.ne.s32.totalorder %s419_s29, %s2306_s24  ;;  %p2314_p10 = scmp.lt.s32.totalorder %s419_s29, %s419_s29 }
  0xe5   : > { %p2315_p11 = scmp.lt.s32.totalorder %s2313_s3, %s2306_s24 }
  0xe6   : > { %p2309_p7 = pnand %p2307_p5, %p2670_p8 }
  0xe7   : > { %p2316_p12 = por %p2315_p11, %p2314_p10 }
  0xe8   : > { %p2310_p9 = pneg %p2309_p7 }
  0xea   : > { %p2317_p4 = pnand %p2316_p12, %p2310_p9 }
  0xec   : > { %2320 = shalt.err (!%p2317_p4)
}
  0xed   : > { %1936 = dma.hbm_to_vmem [thread:$0]  (!%p2656_p6), %s3212_s6, 16, %s419_s29, [#allocation12]  }
  0xee   : > { %s2540_s19 = smov [#allocation16]   ;;  %s2541_s5 = smov [#allocation19]  }
  0xef   : > { %s442_s20 = sshll.u32 %s2540_s19, 4  ;;  %s466_s13 = sshll.u32 %s2541_s5, 4  ;;  %s443_s20 = int_to_ptr.vmem [resolvable:$true] %s442_s20  ;;  %s467_s13 = int_to_ptr.vmem [resolvable:$true] %s466_s13 }
  0xf0   : > { %s2321_s30 = scalar_lea.hbm %s3214_s8, 16 }
  0xf1   : > { %p2322_p1 = scmp.ne.s32.totalorder %s3214_s8, %s2321_s30  ;;  %p2328_p0 = scmp.lt.u32.totalorder %s2321_s30, %s3214_s8 }
  0xf3   : > { %p2324_p3 = pnand %p2322_p1, %p2670_p8 }
  0xf5   : > { %p2325_p13 = pneg %p2324_p3 }
  0xf7   : > { %p2330_p2 = pnand %p2328_p0, %p2325_p13 }
  0xf9   : > { %2333 = shalt.err (!%p2330_p2)
}
  0xfa   : > { %s2334_s29 = scalar_lea.vmem %s443_s20, 16  ;;  %s2341_s23 = scalar_lea.vmem %s443_s20, 32 }
  0xfb   : > { %p2335_p5 = scmp.ne.s32.totalorder %s443_s20, %s2334_s29  ;;  %p2342_p10 = scmp.lt.s32.totalorder %s443_s20, %s443_s20 }
  0xfc   : > { %p2343_p11 = scmp.lt.s32.totalorder %s2341_s23, %s2334_s29 }
  0xfd   : > { %p2337_p7 = pnand %p2335_p5, %p2670_p8 }
  0xfe   : > { %p2344_p12 = por %p2343_p11, %p2342_p10 }
  0xff   : > { %p2338_p9 = pneg %p2337_p7 }
 0x101   : > { %p2345_p4 = pnand %p2344_p12, %p2338_p9 }
 0x103   : > { %2348 = shalt.err (!%p2345_p4)
}
 0x104   : > { %1942 = dma.hbm_to_vmem [thread:$0]  (!%p2656_p6), %s3214_s8, 16, %s443_s20, [#allocation15]  }
 0x105   : > { %s2349_s22 = scalar_lea.hbm %s3216_s10, 32 }
 0x106   : > { %p2350_p1 = scmp.ne.s32.totalorder %s3216_s10, %s2349_s22  ;;  %p2356_p0 = scmp.lt.u32.totalorder %s2349_s22, %s3216_s10 }
 0x108   : > { %p2352_p3 = pnand %p2350_p1, %p2670_p8 }
 0x10a   : > { %p2353_p13 = pneg %p2352_p3 }
 0x10c   : > { %p2358_p2 = pnand %p2356_p0, %p2353_p13 }
 0x10e   : > { %2361 = shalt.err (!%p2358_p2)
}
 0x10f   : > { %s2362_s3 = scalar_lea.vmem %s467_s13, 32  ;;  %p2370_p10 = scmp.lt.s32.totalorder %s467_s13, %s467_s13 }
 0x110   : > { %p2363_p5 = scmp.ne.s32.totalorder %s467_s13, %s2362_s3  ;;  %p2371_p11 = scmp.lt.s32.totalorder %s2362_s3, %s2362_s3 }
 0x112   : > { %p2365_p7 = pnand %p2363_p5, %p2670_p8  ;;  %p2372_p12 = por %p2371_p11, %p2370_p10 }
 0x114   : > { %p2366_p9 = pneg %p2365_p7 }
 0x116   : > { %p2373_p4 = pnand %p2372_p12, %p2366_p9 }
 0x118   : > { %2376 = shalt.err (!%p2373_p4)
}
 0x119   : > { %1948 = dma.hbm_to_vmem [thread:$0]  (!%p2656_p6), %s3216_s10, 32, %s467_s13, [#allocation18]  }
 0x11a   : > { %s2542_s23 = smov [#allocation22]   ;;  %s2377_s21 = scalar_lea.hbm %s3218_s12, 16 }
 0x11b   : > { %s490_s14 = sshll.u32 %s2542_s23, 4  ;;  %p2378_p1 = scmp.ne.s32.totalorder %s3218_s12, %s2377_s21  ;;  %s491_s14 = int_to_ptr.vmem [resolvable:$true] %s490_s14 }
 0x11c   : > { %p2384_p0 = scmp.lt.u32.totalorder %s2377_s21, %s3218_s12 }
 0x11d   : > { %p2380_p3 = pnand %p2378_p1, %p2670_p8 }
 0x11f   : > { %p2381_p13 = pneg %p2380_p3 }
 0x121   : > { %p2386_p2 = pnand %p2384_p0, %p2381_p13 }
 0x123   : > { %2389 = shalt.err (!%p2386_p2)
}
 0x124   : > { %s2390_s13 = scalar_lea.vmem %s491_s14, 16  ;;  %s2397_s24 = scalar_lea.vmem %s491_s14, 32 }
 0x125   : > { %p2391_p5 = scmp.ne.s32.totalorder %s491_s14, %s2390_s13  ;;  %p2398_p10 = scmp.lt.s32.totalorder %s491_s14, %s491_s14 }
 0x126   : > { %p2399_p11 = scmp.lt.s32.totalorder %s2397_s24, %s2390_s13 }
 0x127   : > { %p2393_p7 = pnand %p2391_p5, %p2670_p8 }
 0x128   : > { %p2400_p12 = por %p2399_p11, %p2398_p10 }
 0x129   : > { %p2394_p9 = pneg %p2393_p7 }
 0x12b   : > { %p2401_p4 = pnand %p2400_p12, %p2394_p9 }
 0x12d   : > { %2404 = shalt.err (!%p2401_p4)
}
 0x12e   : > { %s3243_s16 = sld [smem:[#allocation32_spill]]  ;;  %s1665_s29 = sadd.s32 4294967294, %s2525_s28  }
 0x12f   : > { %1954 = dma.hbm_to_vmem [thread:$0]  (!%p2656_p6), %s3218_s12, 16, %s491_s14, [#allocation21]  }
 0x130   : > { %s2920_s18 = sadd.s32 1, %s2525_s28   ;;  %s42_s19 = sadd.s32 1, %s2521_s27 }
 0x131   : > { %s39_s23 = ssub.s32 %s2525_s28, %s2920_s18  ;;  %p49_p1 = scmp.ne.s32.totalorder %s2521_s27, %s2517_s26 }
 0x132   : > { %p40_p8 = scmp.eq.s32.totalorder %s39_s23, 0  ;;  %p50_p3 = scmp.eq.s32.totalorder %s2525_s28, 0 }
 0x133   : > { %p55_p13 = scmp.ne.s32.totalorder %s2517_s26, %s2513_s25  ;;  %p337_p7 = scmp.eq.s32.totalorder %s1665_s29, 1 }
 0x134   : > { %s2931_s5 = scalar_select %p40_p8, %s2521_s27, %s42_s19  }
 0x135   : > { %p2933_p0 = por %p50_p3, %p49_p1  ;;  %p3245_p2 = scmp.eq.s32.totalorder %s3243_s16, 0 }
 0x136   : > { %p331_p5 = scmp.eq.s32.totalorder %s3243_s16, 1  ;;  %p1975_p9 = scmp.lt.s32.totalorder %s2525_s28, 2 }
 0x137   : > { %p2939_p6 = por %p3245_p2, %p55_p13  ;;  %s501_s22 = sand.u32 1, %s2521_s27  }
 0x138   : > { %p2946_p10 = por %p331_p5, %p49_p1  ;;  %p2950_p11 = por %p337_p7, %p55_p13 }
 0x139   : > { %s1680_s1 = sshll.u32 %s501_s22, 6  ;;  %s1732_s13 = sshll.u32 %s2525_s28, 10 }
 0x13a   : > { %s3247_s30 = scalar_select %p2946_p10, 1, 0 }
 0x13b   : > { %s3248_s17 = scalar_select %p2950_p11, 1, 0 }
 0x13c   : > { %s3249_s20 = sld [smem:[#allocation34_spill]]  ;;  %s505_s16 = scalar_lea.vmem [#allocation2], %s1680_s1 }
 0x13d   : > { %s512_s29 = sshll.u32 %s505_s16, 4  ;;  %p2964_p12 = pnand %p1975_p9, %p2933_p0  ;;  %s2960_s29 = int_to_ptr.vmem [resolvable:$true] %s512_s29 }
 0x13e   : > { %s2968_s0 = scalar_lea.sflag [#allocation3], %s501_s22 }
 0x13f   : > { %p2407_p8 = pneg %p2964_p12 }
 0x142   : > { %s2958_s23 = scalar_lea.hbm %s3249_s20, %s1732_s13  ;;  %s2410_s21 = scalar_lea.hbm %s3249_s20, 2048 }
 0x143   : > { %s2405_s24 = scalar_lea.hbm %s2958_s23, 1024  ;;  %p2411_p13 = scmp.lt.u32.totalorder %s2958_s23, %s3249_s20 }
 0x144   : > { %p2406_p4 = scmp.ne.s32.totalorder %s2958_s23, %s2405_s24  ;;  %p2412_p0 = scmp.lt.u32.totalorder %s2410_s21, %s2405_s24 }
 0x145   : > { %p2414_p5 = scmp.lt.u32.totalorder %s2405_s24, %s2958_s23 }
 0x146   : > { %p2408_p1 = pnand %p2407_p8, %p2406_p4  ;;  %p2413_p2 = por %p2412_p0, %p2411_p13 }
 0x148   : > { %p2409_p3 = pneg %p2408_p1  ;;  %p2415_p7 = por %p2414_p5, %p2413_p2 }
 0x14a   : > { %p2416_p9 = pnand %p2415_p7, %p2409_p3 }
 0x14c   : > { %2419 = shalt.err (!%p2416_p9)
}
 0x14d   : > { %s2420_s22 = scalar_lea.vmem %s2960_s29, 1024  ;;  %s2543_s1 = smov [#allocation2]  }
 0x14e   : > { %p2421_p4 = scmp.ne.s32.totalorder %s2960_s29, %s2420_s22  ;;  %s2425_s13 = sshll.u32 %s2543_s1, 4  ;;  %s2426_s13 = int_to_ptr.vmem [resolvable:$false] %s2425_s13 }
 0x14f   : > { %s2427_s3 = scalar_lea.vmem %s2426_s13, 2048  ;;  %p2428_p10 = scmp.lt.s32.totalorder %s2960_s29, %s2426_s13 }
 0x150   : > { %p2423_p1 = pnand %p2421_p4, %p2407_p8  ;;  %p2429_p13 = scmp.lt.s32.totalorder %s2427_s3, %s2420_s22 }
 0x152   : > { %p2424_p11 = pneg %p2423_p1  ;;  %p2430_p0 = por %p2429_p13, %p2428_p10 }
 0x154   : > { %p2431_p2 = pnand %p2430_p0, %p2424_p11 }
 0x156   : > { %2434 = shalt.err (!%p2431_p2)
}
 0x157   : > { %s3251_s24 = smov 128   ;;  %s3252_s21 = sld [smem:[#allocation33_spill]] }
 0x158   : > { %1958 = dma.hbm_to_vmem [thread:$0]  (!%p2964_p12), %s2958_s23, 1024, %s2960_s29, %s2968_s0, %s3251_s24, %s3251_s24, %s2537_s15  }
 0x15d   : > { %p3253_p8 = scmp.ne.s32.totalorder %s3252_s21, 0 }
 0x15e   : > { %s3002_s16 = sand.u32 (!%p3253_p8), 1, %s2517_s26  }
 0x15f   : > { %524 = sbr.rel (%p3253_p8) target bundleno = 1440 (0x5a0), region = 72  ;;  %s1684_s22 = sshll.u32 (!%p3253_p8), %s3002_s16, 6 }
 0x160   : > { %s527_s1 = scalar_lea.sflag (!%p3253_p8), [#allocation3], %s3002_s16  ;;  %s3006_s13 = scalar_lea.vmem (!%p3253_p8), [#allocation2], %s1684_s22 }
 0x166   : > { %2480 = dma.done.wait (%p2939_p6), %s527_s1, 1024  }
 0x167   : > { %2482 = vsyncadd (%p2939_p6), %s527_s1, 4294966272  ;;  %s3254_s19 = sld [smem:[#allocation32_spill]] }
 0x16d   : > { %p3255_p10 = scmp.eq.s32.totalorder %s3254_s19, 0 }
 0x16f   : > { %2484 = dma.done.wait (%p3255_p10), [#allocation6], 1040   ;;  %p3256_p11 = pmov %p3255_p10 }
 0x170   : > { %p3257_p12 = pmov %p3255_p10 }
 0x171   : > { %2486 = vsyncadd (%p3256_p11), [#allocation6], 4294966256 }
 0x172   : > { %2488 = dma.done.wait (%p3257_p12), [#allocation9], 272   ;;  %p3258_p3 = pmov %p3255_p10 }
 0x174   : > { %2490 = vsyncadd (%p3258_p3), [#allocation9], 4294967024  ;;  %p3259_p5 = pmov %p3258_p3 }
 0x175   : > { %p3260_p7 = pmov %p3258_p3 }
 0x176   : > { %2492 = dma.done.wait (%p3259_p5), [#allocation12], 272  }
 0x177   : > { %2494 = vsyncadd (%p3260_p7), [#allocation12], 4294967024  ;;  %p3261_p6 = pmov %p3258_p3 }
 0x178   : > { %p3262_p9 = pmov %p3258_p3 }
 0x179   : > { %2496 = dma.done.wait (%p3261_p6), [#allocation15], 272  }
 0x17a   : > { %2498 = vsyncadd (%p3262_p9), [#allocation15], 4294967024  ;;  %p3263_p4 = pmov %p3258_p3 }
 0x17b   : > { %p3264_p1 = pmov %p3258_p3 }
 0x17c   : > { %2500 = dma.done.wait (%p3263_p4), [#allocation18], 288  }
 0x17d   : > { %2502 = vsyncadd (%p3264_p1), [#allocation18], 4294967008  ;;  %p3265_p13 = pmov %p3264_p1 }
 0x17e   : > { %p3266_p0 = pmov %p3264_p1 }
 0x17f   : > { %2504 = dma.done.wait (%p3265_p13), [#allocation21], 272  }
 0x180   : > { %2506 = vsyncadd (%p3266_p0), [#allocation21], 4294967024  ;;  %v2544_v0 = vmov 0.0   ;;  %vm2545_vm0 = vmmov 0   ;;  %v2039_v1 = vld [vmem:[#allocation8] sm:$0xff]   ;;  %v2040_v2 = vld [vmem:[#allocation11] sm:$0xff]   ;;  %v794_v60 = vlaneseq }
 0x181   : > { %1773 = vmatprep.subr.bf16.mxu0 %v2544_v0  ;;  %1781 = vmatprep.subr.bf16.mxu1 %v2544_v0  ;;  %v2041_v3 = vld [vmem:[#allocation8 + $0x8] sm:$0xff]   ;;  %vm629_vm1 = vcmask 261120   ;;  %v2042_v4 = vld [vmem:[#allocation11 + $0x8] sm:$0xff]   ;;  %v657_v42 = vld [vmem:[#allocation7 + $0x10] sm:$0xff]  ;;  %vm1253_vm2 = vcmask 1041408   ;;  %vm1158_vm3 = vcmask 31744  }
 0x182   : > { %1777 = vmatprep.mubr.msk.bf16.mxu0 %vm2545_vm0, %v2544_v0  ;;  %1785 = vmatprep.mubr.msk.bf16.mxu1 %vm2545_vm0, %v2544_v0  ;;  %v621_v5 = vld [vmem:[%s3006_s13] sm:$0xff]  ;;  %v622_v6 = vld [vmem:[%s3006_s13 + $0x8] sm:$0xff]  ;;  %v623_v7 = vld [vmem:[%s3006_s13 + $0x10] sm:$0xff]  ;;  %v795_v63 = vshrl.u32 %v794_v60, 7  ;;  %s1729_s0 = sshll.u32 %s3254_s19, 4  ;;  %s619_s15 = scalar_lea.vmem [#allocation23], %s3002_s16 }
 0x183   : > { %1774 = vmatpush3.bf16.msra.mxu0 %v2039_v1  ;;  %1782 = vmatpush3.bf16.msra.mxu1 %v2040_v2  ;;  %v624_v8 = vld [vmem:[%s3006_s13 + $0x18] sm:$0xff]  ;;  %v630_v9 = vsel %vm629_vm1, %v621_v5, 0.0  ;;  %v631_v10 = vsel %vm629_vm1, %v622_v6, 0.0  ;;  %v633_v11 = vsel %vm629_vm1, %v623_v7, 0.0  ;;  %v625_v12 = vld [vmem:[%s3006_s13 + $0x20] sm:$0xff]  ;;  %v626_v14 = vld [vmem:[%s3006_s13 + $0x28] sm:$0xff]  ;;  %v665_v47 = vadd.f32 %v657_v42, %v623_v7 }
 0x184   : > { %1775 = vmatprep.subr.bf16.mxu0 %v2544_v0  ;;  %1783 = vmatprep.subr.bf16.mxu1 %v2544_v0  ;;  %v632_v13 = vadd.f32 %v631_v10, %v630_v9  ;;  %v627_v15 = vld [vmem:[%s3006_s13 + $0x30] sm:$0xff]  ;;  %v635_v16 = vsel %vm629_vm1, %v624_v8, 0.0  ;;  %v637_v18 = vsel %vm629_vm1, %v625_v12, 0.0  ;;  %v628_v19 = vld [vmem:[%s3006_s13 + $0x38] sm:$0xff]  ;;  %v639_v21 = vsel %vm629_vm1, %v626_v14, 0.0  ;;  %v655_v33 = vld [vmem:[#allocation7] sm:$0xff] }
 0x185   : > { %v641_v22 = vsel %vm629_vm1, %v627_v15, 0.0  ;;  %v643_v25 = vsel %vm629_vm1, %v628_v19, 0.0  ;;  %v656_v34 = vld [vmem:[#allocation7 + $0x8] sm:$0xff]  ;;  %v653_v36 = vld [vmem:[#allocation5] sm:$0x1]  ;;  %v663_v37 = vadd.f32 %v655_v33, %v621_v5  ;;  %v659_v45 = vld [vmem:[#allocation7 + $0x20] sm:$0xff] }
 0x186   : > { %v634_v17 = vadd.f32 %v633_v11, %v632_v13  ;;  %v664_v38 = vadd.f32 %v656_v34, %v622_v6  ;;  %v658_v43 = vld [vmem:[#allocation7 + $0x18] sm:$0xff]  ;;  %v660_v46 = vld [vmem:[#allocation7 + $0x28] sm:$0xff]  ;;  %v667_v49 = vadd.f32 %v659_v45, %v625_v12  ;;  %v661_v53 = vld [vmem:[#allocation7 + $0x30] sm:$0xff]  ;;  %v3089_v9 = vsub.s32 0, %v795_v63  ;;  %s1485_s14 = sshll.u32 %s619_s15, 4  ;;  %s3267_s3 = sld [smem:[#allocation38_spill]]  ;;  %s3164_s14 = int_to_ptr.vmem [resolvable:$true] %s1485_s14 }
 0x187   : > { %1776 = vmatpush3.bf16.msra.mxu0 %v2041_v3  ;;  %1784 = vmatpush3.bf16.msra.mxu1 %v2042_v4  ;;  %v666_v48 = vadd.f32 %v658_v43, %v624_v8  ;;  %v668_v50 = vadd.f32 %v660_v46, %v626_v14  ;;  %v662_v54 = vld [vmem:[#allocation7 + $0x38] sm:$0xff]  ;;  %v669_v56 = vadd.f32 %v661_v53, %v627_v15  ;;  %v680_v61 = vld [vmem:[#allocation10] sm:$0x1]  ;;  %v740_v62 = vld [vmem:[#allocation13] sm:$0x1]  ;;  %vm1470_vm4 = vcmask 122880  }
 0x188   : > { %1789 = vmatprep.subr.bf16.mxu0 %v2040_v2  ;;  %1801 = vmatprep.subr.bf16.mxu1 %v2544_v0  ;;  %v636_v20 = vadd.f32 %v635_v16, %v634_v17  ;;  %v3061_v41 = vpack.c.bf16 %v664_v38, %v663_v37  ;;  %v2043_v55 = vld [vmem:[#allocation17] sm:$0xff]   ;;  %v670_v57 = vadd.f32 %v662_v54, %v628_v19  ;;  %v2044_v59 = vld [vmem:[#allocation17 + $0x8] sm:$0xff]   ;;  %s1473_s21 = scalar_lea.sflag [#allocation4], %s3002_s16  ;;  %s2435_s22 = scalar_lea.vmem %s3164_s14, 16 }
 0x189   : > { %v3073_v51 = vpack.c.bf16 %v666_v48, %v665_v47  ;;  %v3075_v52 = vpack.c.bf16 %v668_v50, %v667_v49  ;;  %v797_v13 = vrot.slane %v740_v62, %v3089_v9  ;;  %v2045_v46 = vld [vmem:[#allocation14] sm:$0xff]   ;;  %v2046_v47 = vld [vmem:[#allocation14 + $0x8] sm:$0xff]   ;;  %p2436_p2 = scmp.ne.s32.totalorder %s3164_s14, %s2435_s22  ;;  %p3268_p8 = scmp.ne.s32.totalorder %s3247_s30, 0 }
 0x18a   : > { %v638_v23 = vadd.f32 %v637_v18, %v636_v20  ;;  %v3083_v58 = vpack.c.bf16 %v670_v57, %v669_v56  ;;  %v1249_v48 = vld [vmem:[#allocation19] sm:$0x3]  ;;  %s2546_s1 = smov [#allocation23]  }
 0x18b   : > { %p2437_p10 = pnand %p2436_p2, %p3268_p8  ;;  %s2439_s13 = sshll.u32 %s2546_s1, 4  ;;  %s2440_s13 = int_to_ptr.vmem [resolvable:$false] %s2439_s13 }
 0x18c   : > { %v640_v24 = vadd.f32 %v639_v21, %v638_v23  ;;  %s3162_s24 = scalar_lea.hbm %s3267_s3, %s1729_s0  ;;  %s2441_s19 = scalar_lea.vmem %s2440_s13, 32 }
 0x18d   : > { %p2438_p11 = pneg %p2437_p10  ;;  %p2442_p12 = scmp.lt.s32.totalorder %s3164_s14, %s2440_s13 }
 0x18e   : > { %v642_v26 = vadd.f32 %v641_v22, %v640_v24  ;;  %p2443_p3 = scmp.lt.s32.totalorder %s2441_s19, %s2435_s22 }
 0x190   : > { %v644_v27 = vadd.f32 %v643_v25, %v642_v26  ;;  %p2444_p5 = por %p2443_p3, %p2442_p12 }
 0x192   : > { %v645_v28 = vrot.slane %v644_v27, 4  ;;  %p2445_p7 = pnand %p2444_p5, %p2438_p11 }
 0x194   : > { %v646_v29 = vadd.f32 %v645_v28, %v644_v27 }
 0x196   : > { %v647_v30 = vrot.slane %v646_v29, 2 }
 0x198   : > { %v648_v31 = vadd.f32 %v647_v30, %v646_v29 }
 0x19a   : > { %v649_v32 = vrot.slane %v648_v31, 1 }
 0x19c   : > { %v650_v35 = vadd.f32 %v649_v32, %v648_v31 }
 0x19e   : > { %v652_v39 = vmul.f32 0.015625, %v650_v35 }
 0x1a0   : > { %v654_v40 = vadd.f32 %v653_v36, %v652_v39 }
 0x1a2   : > { %v3063_v44 = vpack.c.bf16 %v654_v40, %v654_v40 }
 0x1a4   : > { %1778 = vmatmul.mubr.msk.bf16.vlgmr.msra.gmra.mrb[0].mxu0 %vm629_vm1, %v3063_v44  ;;  %1786 = vmatmul.mubr.msk.bf16.vlgmr.msra.gmra.mrb[0].mxu1 %vm629_vm1, %v3063_v44 }
 0x1a5   : > { %1790 = vmatpush3.bf16.msra.mxu0 %v2040_v2  ;;  %1793 = vmatprep.mubr.msk.bf16.mxu0 %vm629_vm1, %v3061_v41 }
 0x1a6   : > { %1791 = vmatprep.subr.bf16.mxu0 %v2042_v4  ;;  %1805 = vmatprep.mubr.msk.bf16.mxu1 %vm2545_vm0, %v2544_v0 }
 0x1a7   : > { %1802 = vmatpush3.bf16.msra.mxu1 %v2045_v46 }
 0x1a8   : > { %1803 = vmatprep.subr.bf16.mxu1 %v2544_v0 }
 0x1a9   : > { %1792 = vmatpush3.bf16.msra.mxu0 %v2042_v4 }
 0x1aa   : > { %1821 = vmatprep.subr.bf16.mxu0 %v2544_v0 }
 0x1ab   : > { %1804 = vmatpush3.bf16.msra.mxu1 %v2046_v47 }
 0x1ac   : > { %1794 = vmatmul.mubr.msk.bf16.vlgmr.msra.gmra.mrb[4].mxu0 %vm629_vm1, %v3073_v51  ;;  %1809 = vmatprep.subr.bf16.mxu1 %v2045_v46 }
 0x1ad   : > { %1797 = vmatprep.mubr.msk.bf16.mxu0 %vm629_vm1, %v3075_v52  ;;  %1822 = vmatpush3.bf16.msra.mxu0 %v2043_v55 }
 0x1ae   : > { %1823 = vmatprep.subr.bf16.mxu0 %v2544_v0  ;;  %1806 = vmatmul.mubr.msk.bf16.vlgmr.msra.gmra.mrb[4].mxu1 %vm629_vm1, %v3063_v44  ;;  %v3115_v44 = vsel %vm1253_vm2, %v1249_v48, 0 }
 0x1af   : > { %1810 = vmatpush3.bf16.msra.mxu1 %v2045_v46  ;;  %1813 = vmatprep.mubr.msk.bf16.mxu1 %vm629_vm1, %v3061_v41 }
 0x1b0   : > { %1811 = vmatprep.subr.bf16.mxu1 %v2046_v47 }
 0x1b1   : > { %1824 = vmatpush3.bf16.msra.mxu0 %v2044_v59 }
 0x1b2   : > { %1829 = vmatprep.subr.bf16.mxu0 %v2043_v55 }
 0x1b3   : > { %1812 = vmatpush3.bf16.msra.mxu1 %v2046_v47 }
 0x1b4   : > { %1798 = vmatmul.mubr.msk.bf16.gmra.mrb[8].mxu0 %vm629_vm1, %v3083_v58  ;;  %1841 = vmatprep.subr.bf16.mxu1 %v2544_v0 }
 0x1b5   : > { %1825 = vmatprep.mubr.msk.bf16.mxu0 %vm2545_vm0, %v2544_v0 }
 0x1b6   : > { %1814 = vmatmul.mubr.msk.bf16.vlgmr.msra.gmra.mrb[8].mxu1 %vm629_vm1, %v3073_v51 }
 0x1b7   : > { %1817 = vmatprep.mubr.msk.bf16.mxu1 %vm629_vm1, %v3075_v52  ;;  %1842 = vmatpush3.bf16.msra.mxu1 %v3115_v44 }
 0x1b8   : > { %1865 = vmatprep.subr.msk.bf16.mxu1 %vm1253_vm2, %v1249_v48 }
 0x1be   : > { %1818 = vmatmul.mubr.msk.bf16.gmra.mrb[12].mxu1 %vm629_vm1, %v3083_v58 }
 0x1bf   : > { %1843 = vmatprep.mubr.msk.bf16.mxu1 %vm2545_vm0, %v2544_v0 }
 0x277   : > { %v730_v1 = vpop.f32.mrb[0].mxu0  ;;  %v787_v2 = vpop.f32.mrb[0].mxu1 }
 0x278   : > { %v731_v3 = vadd.f32 %v730_v1, %v680_v61  ;;  %v788_v4 = vadd.f32 %v787_v2, %v740_v62  ;;  %v1779_v5 = vpop.f32.mrb[1].mxu0  ;;  %v1787_v6 = vpop.f32.mrb[1].mxu1 }
 0x279   : > { %v733_v7 = vpop.f32.mrb[2].mxu0  ;;  %v790_v8 = vpop.f32.mrb[2].mxu1 }
 0x27a   : > { %v1004_v10 = vmul.f32 %v788_v4, %v731_v3  ;;  %v1780_v11 = vpop.f32.mrb[3].mxu0  ;;  %v1788_v12 = vpop.f32.mrb[3].mxu1  ;;  %v1068_v16 = vrot.slane %v731_v3, %v3089_v9 }
 0x27c   : > { %v1005_v14 = vpack.c.bf16 %v1004_v10, %v1004_v10 }
 0x27e   : > { %1826 = vmatmul.mubr.msk.bf16.vlgmr.msra.gmra.mrb[12].mxu0 %vm629_vm1, %v1005_v14 }
 0x27f   : > { %v1795_v15 = vpop.f32.mrb[4].mxu0  ;;  %1830 = vmatpush3.bf16.msra.mxu0 %v2043_v55 }
 0x280   : > { %v854_v17 = vadd.f32 %v1795_v15, %v797_v13  ;;  %v845_v18 = vpop.f32.mrb[5].mxu0  ;;  %1831 = vmatprep.subr.bf16.mxu0 %v2044_v59 }
 0x281   : > { %v846_v19 = vadd.f32 %v845_v18, %v797_v13  ;;  %v1796_v20 = vpop.f32.mrb[6].mxu0 }
 0x282   : > { %v1071_v21 = vmul.f32 %v1068_v16, %v854_v17  ;;  %v857_v22 = vadd.f32 %v1796_v20, %v797_v13  ;;  %v848_v23 = vpop.f32.mrb[7].mxu0 }
 0x283   : > { %v1069_v24 = vmul.f32 %v1068_v16, %v846_v19  ;;  %v849_v25 = vadd.f32 %v848_v23, %v797_v13  ;;  %1832 = vmatpush3.bf16.msra.mxu0 %v2044_v59 }
 0x284   : > { %v1072_v26 = vmul.f32 %v1068_v16, %v857_v22  ;;  %1857 = vmatprep.subr.bf16.mxu0 %v2544_v0 }
 0x285   : > { %v1070_v27 = vmul.f32 %v1068_v16, %v849_v25 }
 0x286   : > { %v1078_v28 = vpack.c.bf16 %v1072_v26, %v1071_v21 }
 0x287   : > { %v1077_v29 = vpack.c.bf16 %v1070_v27, %v1069_v24  ;;  %v1799_v30 = vpop.f32.mrb[8].mxu0 }
 0x288   : > { %v870_v31 = vadd.f32 %v1799_v30, %v797_v13  ;;  %v861_v32 = vpop.f32.mrb[9].mxu0 }
 0x289   : > { %v862_v33 = vadd.f32 %v861_v32, %v797_v13  ;;  %v1800_v34 = vpop.f32.mrb[10].mxu0  ;;  %1833 = vmatprep.mubr.msk.bf16.mxu0 %vm629_vm1, %v1077_v29 }
 0x28a   : > { %v1075_v35 = vmul.f32 %v1068_v16, %v870_v31  ;;  %v873_v36 = vadd.f32 %v1800_v34, %v797_v13  ;;  %v864_v37 = vpop.f32.mrb[11].mxu0  ;;  %1834 = vmatmul.mubr.msk.bf16.vlgmr.msra.gmra.mrb[16].mxu0 %vm629_vm1, %v1078_v28 }
 0x28b   : > { %v1073_v38 = vmul.f32 %v1068_v16, %v862_v33  ;;  %v865_v39 = vadd.f32 %v864_v37, %v797_v13 }
 0x28c   : > { %v1076_v40 = vmul.f32 %v1068_v16, %v873_v36 }
 0x28d   : > { %v1074_v42 = vmul.f32 %v1068_v16, %v865_v39 }
 0x28e   : > { %v1080_v43 = vpack.c.bf16 %v1076_v40, %v1075_v35 }
 0x28f   : > { %v1079_v45 = vpack.c.bf16 %v1074_v42, %v1073_v38 }
 0x291   : > { %1837 = vmatprep.mubr.msk.bf16.mxu0 %vm629_vm1, %v1079_v45 }
 0x292   : > { %1838 = vmatmul.mubr.msk.bf16.gmra.mrb[20].mxu0 %vm629_vm1, %v1080_v43 }
 0x293   : > { %1861 = vmatprep.mubr.msk.bf16.mxu0 %vm2545_vm0, %v2544_v0 }
 0x351   : > { %v3118_v41 = vpop.f32.mrb[12].mxu0 }
 0x352   : > { %v1827_v49 = vpop.f32.mrb[13].mxu0 }
 0x353   : > { %v1062_v50 = vpop.f32.mrb[14].mxu0 }
 0x354   : > { %v1828_v51 = vpop.f32.mrb[15].mxu0 }
 0x35d   : > { %v1835_v53 = vpop.f32.mrb[16].mxu0 }
 0x35e   : > { %v1127_v52 = vpop.f32.mrb[17].mxu0  ;;  %v1161_v57 = vsel %vm1158_vm3, %v1835_v53, -inf }
 0x35f   : > { %v1836_v54 = vpop.f32.mrb[18].mxu0  ;;  %v1159_v60 = vsel %vm1158_vm3, %v1127_v52, -inf }
 0x360   : > { %v1130_v55 = vpop.f32.mrb[19].mxu0  ;;  %v1162_v1 = vsel %vm1158_vm3, %v1836_v54, -inf }
 0x361   : > { %v1160_v5 = vsel %vm1158_vm3, %v1130_v55, -inf }
 0x365   : > { %v1839_v56 = vpop.f32.mrb[20].mxu0 }
 0x366   : > { %v1167_v58 = vsel %vm1158_vm3, %v1839_v56, -inf  ;;  %v1143_v59 = vpop.f32.mrb[21].mxu0 }
 0x367   : > { %v1168_v61 = vmax.f32 %v1161_v57, %v1167_v58  ;;  %v1163_v62 = vsel %vm1158_vm3, %v1143_v59, -inf  ;;  %v1840_v63 = vpop.f32.mrb[22].mxu0 }
 0x368   : > { %v1164_v2 = vmax.f32 %v1159_v60, %v1163_v62  ;;  %v1169_v3 = vsel %vm1158_vm3, %v1840_v63, -inf  ;;  %v1146_v4 = vpop.f32.mrb[23].mxu0 }
 0x369   : > { %v1170_v6 = vmax.f32 %v1162_v1, %v1169_v3  ;;  %v1165_v7 = vsel %vm1158_vm3, %v1146_v4, -inf }
 0x36a   : > { %v1166_v8 = vmax.f32 %v1160_v5, %v1165_v7 }
 0x36b   : > { %v1172_v10 = vmax.f32 %v1168_v61, %v1170_v6 }
 0x36c   : > { %v1171_v11 = vmax.f32 %v1164_v2, %v1166_v8 }
 0x36e   : > { %v1173_v12 = vmax.f32 %v1171_v11, %v1172_v10 }
 0x370   : > { %v1174_v13 = vrot.slane %v1173_v12, 4 }
 0x372   : > { %v1175_v14 = vmax.f32 %v1173_v12, %v1174_v13 }
 0x374   : > { %v1176_v15 = vrot.slane %v1175_v14, 2 }
 0x376   : > { %v1177_v16 = vmax.f32 %v1175_v14, %v1176_v15 }
 0x378   : > { %v1178_v17 = vrot.slane %v1177_v16, 1 }
 0x37a   : > { %v1179_v18 = vmax.f32 %v1177_v16, %v1178_v17 }
 0x37c   : > { %v1180_v19 = vmax.f32 %v3118_v41, %v1179_v18 }
 0x37e   : > { %v1181_v20 = vsub.f32 %v3118_v41, %v1180_v19  ;;  %v1187_v21 = vrot.slane %v1180_v19, %v3089_v9 }
 0x380   : > { %v1188_v22 = vsub.f32 %v1127_v52, %v1187_v21  ;;  %v1189_v23 = vsub.f32 %v1130_v55, %v1187_v21  ;;  %v1190_v24 = vsub.f32 %v1835_v53, %v1187_v21  ;;  %v1191_v25 = vsub.f32 %v1836_v54, %v1187_v21 }
 0x381   : > { %v1192_v26 = vsub.f32 %v1143_v59, %v1187_v21  ;;  %v1193_v27 = vsub.f32 %v1146_v4, %v1187_v21  ;;  %v1194_v28 = vsub.f32 %v1839_v56, %v1187_v21  ;;  %v1195_v29 = vsub.f32 %v1840_v63, %v1187_v21 }
 0x382   : > { %v1196_v30 = vmul.f32 1.442695, %v1188_v22  ;;  %v1198_v31 = vmul.f32 1.442695, %v1189_v23  ;;  %v1200_v32 = vmul.f32 1.442695, %v1190_v24 }
 0x383   : > { %v1202_v33 = vmul.f32 1.442695, %v1191_v25  ;;  %v1204_v34 = vmul.f32 1.442695, %v1192_v26  ;;  %v1206_v35 = vmul.f32 1.442695, %v1193_v27 }
 0x384   : > { %2049 = vpow2.f32 %v1196_v30  ;;  %v1208_v36 = vmul.f32 1.442695, %v1194_v28  ;;  %v1210_v37 = vmul.f32 1.442695, %v1195_v29  ;;  %v1182_v60 = vmul.f32 1.442695, %v1181_v20 }
 0x385   : > { %2051 = vpow2.f32 %v1198_v31  ;;  %v927_v25 = vpop.f32.mrb[4].mxu1 }
 0x386   : > { %2053 = vpow2.f32 %v1200_v32  ;;  %v1807_v26 = vpop.f32.mrb[5].mxu1 }
 0x387   : > { %2055 = vpow2.f32 %v1202_v33  ;;  %v930_v27 = vpop.f32.mrb[6].mxu1 }
 0x388   : > { %2057 = vpow2.f32 %v1204_v34  ;;  %v1808_v28 = vpop.f32.mrb[7].mxu1 }
 0x389   : > { %2059 = vpow2.f32 %v1206_v35  ;;  %v1815_v29 = vpop.f32.mrb[8].mxu1 }
 0x38a   : > { %2061 = vpow2.f32 %v1208_v36  ;;  %v973_v30 = vpop.f32.mrb[9].mxu1  ;;  %v2047_v36 = vld [vmem:[#allocation20] sm:$0xff]  }
 0x38b   : > { %2063 = vpow2.f32 %v1210_v37  ;;  %v1816_v31 = vpop.f32.mrb[10].mxu1  ;;  %1858 = vmatpush3.bf16.msra.mxu0 %v2047_v36  ;;  %v2048_v37 = vld [vmem:[#allocation20 + $0x8] sm:$0xff]  }
 0x38c   : > { %2065 = vpow2.f32 %v1182_v60  ;;  %v976_v32 = vpop.f32.mrb[11].mxu1  ;;  %1859 = vmatprep.subr.bf16.mxu0 %v2544_v0 }
 0x38e   : > { %v2050_v38 = vpop.eup %2049 }
 0x38f   : > { %v2052_v39 = vpop.eup %2051  ;;  %v1212_v40 = vsel %vm1158_vm3, %v2050_v38, 0.0  ;;  %1860 = vmatpush3.bf16.msra.mxu0 %v2048_v37 }
 0x390   : > { %v2054_v42 = vpop.eup %2053  ;;  %v1213_v43 = vsel %vm1158_vm3, %v2052_v39, 0.0 }
 0x391   : > { %v2056_v45 = vpop.eup %2055  ;;  %v1214_v46 = vadd.f32 %v1213_v43, %v1212_v40  ;;  %v1215_v47 = vsel %vm1158_vm3, %v2054_v42, 0.0 }
 0x392   : > { %v2058_v48 = vpop.eup %2057  ;;  %v1217_v49 = vsel %vm1158_vm3, %v2056_v45, 0.0 }
 0x393   : > { %v1216_v41 = vadd.f32 %v1215_v47, %v1214_v46  ;;  %v2060_v50 = vpop.eup %2059  ;;  %v1219_v53 = vsel %vm1158_vm3, %v2058_v48, 0.0 }
 0x394   : > { %v2062_v52 = vpop.eup %2061  ;;  %v1221_v55 = vsel %vm1158_vm3, %v2060_v50, 0.0 }
 0x395   : > { %v1218_v51 = vadd.f32 %v1217_v49, %v1216_v41  ;;  %v2064_v56 = vpop.eup %2063  ;;  %v1223_v58 = vsel %vm1158_vm3, %v2062_v52, 0.0 }
 0x396   : > { %v1225_v61 = vsel %vm1158_vm3, %v2064_v56, 0.0  ;;  %v2066_v6 = vpop.eup %2065 }
 0x397   : > { %v1220_v54 = vadd.f32 %v1219_v53, %v1218_v51 }
 0x399   : > { %v1222_v57 = vadd.f32 %v1221_v55, %v1220_v54 }
 0x39b   : > { %v1224_v59 = vadd.f32 %v1223_v58, %v1222_v57 }
 0x39d   : > { %v1226_v62 = vadd.f32 %v1225_v61, %v1224_v59 }
 0x39f   : > { %v1227_v63 = vrot.slane %v1226_v62, 4 }
 0x3a1   : > { %v1228_v1 = vadd.f32 %v1227_v63, %v1226_v62 }
 0x3a3   : > { %v1229_v2 = vrot.slane %v1228_v1, 2 }
 0x3a5   : > { %v1230_v3 = vadd.f32 %v1229_v2, %v1228_v1 }
 0x3a7   : > { %v1231_v4 = vrot.slane %v1230_v3, 1 }
 0x3a9   : > { %v1232_v5 = vadd.f32 %v1231_v4, %v1230_v3 }
 0x3ab   : > { %v1233_v7 = vadd.f32 %v2066_v6, %v1232_v5 }
 0x3ad   : > { %2067 = vrcp.f32 %v1233_v7 }
 0x3b7   : > { %v2068_v8 = vpop.eup %2067 }
 0x3b8   : > { %v1239_v10 = vrot.slane %v2068_v8, %v3089_v9  ;;  %v1235_v11 = vmul.f32 %v2068_v8, %v2066_v6 }
 0x3ba   : > { %v1248_v12 = vpack.c.bf16 %v1235_v11, %v1235_v11  ;;  %v1240_v13 = vmul.f32 %v2050_v38, %v1239_v10  ;;  %v1241_v14 = vmul.f32 %v2052_v39, %v1239_v10  ;;  %v1242_v15 = vmul.f32 %v2054_v42, %v1239_v10  ;;  %v880_v38 = vld [vmem:[#allocation16] sm:$0x1] }
 0x3bb   : > { %v1243_v16 = vmul.f32 %v2056_v45, %v1239_v10  ;;  %v1244_v17 = vmul.f32 %v2058_v48, %v1239_v10  ;;  %v1245_v18 = vmul.f32 %v2060_v50, %v1239_v10  ;;  %v1246_v19 = vmul.f32 %v2062_v52, %v1239_v10 }
 0x3bc   : > { %1844 = vmatmul.mubr.msk.bf16.vlgmr.msra.gmra.mrb[16].mxu1 %vm1158_vm3, %v1248_v12  ;;  %v1297_v20 = vpack.c.bf16 %v1241_v14, %v1240_v13  ;;  %v1247_v21 = vmul.f32 %v2064_v56, %v1239_v10  ;;  %v928_v39 = vadd.f32 %v927_v25, %v880_v38  ;;  %v937_v46 = vrot.slane %v880_v38, %v3089_v9 }
 0x3bd   : > { %1848 = vmatpush3.bf16.msra.mxu1 %v3115_v44  ;;  %v1298_v22 = vpack.c.bf16 %v1243_v16, %v1242_v15  ;;  %v1299_v23 = vpack.c.bf16 %v1245_v18, %v1244_v17  ;;  %v1819_v44 = vpop.f32.mrb[12].mxu1 }
 0x3be   : > { %1849 = vmatprep.mubr.msk.bf16.mxu1 %vm1158_vm3, %v1297_v20  ;;  %v1300_v24 = vpack.c.bf16 %v1247_v21, %v1246_v19  ;;  %v989_v33 = vpop.f32.mrb[13].mxu1  ;;  %v982_v48 = vadd.f32 %v1815_v29, %v937_v46  ;;  %v974_v41 = vadd.f32 %v973_v30, %v937_v46  ;;  %v985_v50 = vadd.f32 %v1816_v31, %v937_v46  ;;  %v1414_v30 = vld [vmem:[#allocation22] sm:$0x1] }
 0x3bf   : > { %v1820_v34 = vpop.f32.mrb[14].mxu1  ;;  %v977_v52 = vadd.f32 %v976_v32, %v937_v46  ;;  %v998_v60 = vadd.f32 %v1819_v44, %v937_v46  ;;  %v990_v9 = vadd.f32 %v989_v33, %v937_v46 }
 0x3c0   : > { %v992_v35 = vpop.f32.mrb[15].mxu1  ;;  %v1001_v1 = vadd.f32 %v1820_v34, %v937_v46 }
 0x3c1   : > { %v993_v5 = vadd.f32 %v992_v35, %v937_v46 }
 0x3c4   : > { %1850 = vmatmul.mubr.msk.bf16.vlgmr.msra.gmra.mrb[20].mxu1 %vm1158_vm3, %v1298_v22 }
 0x3c5   : > { %1853 = vmatprep.mubr.msk.bf16.mxu1 %vm1158_vm3, %v1299_v23 }
 0x3cc   : > { %1854 = vmatmul.mubr.msk.bf16.gmra.mrb[24].mxu1 %vm1158_vm3, %v1300_v24 }
 0x48f   : > { %v1291_v40 = vpop.f32.mrb[16].mxu1 }
 0x490   : > { %v1378_v42 = vmul.f32 %v1291_v40, %v928_v39  ;;  %v1845_v43 = vpop.f32.mrb[17].mxu1 }
 0x491   : > { %v1294_v45 = vpop.f32.mrb[18].mxu1 }
 0x492   : > { %v1846_v47 = vpop.f32.mrb[19].mxu1 }
 0x497   : > { %v1851_v49 = vpop.f32.mrb[20].mxu1 }
 0x498   : > { %v1381_v51 = vmul.f32 %v1851_v49, %v982_v48  ;;  %v1347_v53 = vpop.f32.mrb[21].mxu1 }
 0x499   : > { %v1379_v54 = vmul.f32 %v1347_v53, %v974_v41  ;;  %v1852_v55 = vpop.f32.mrb[22].mxu1 }
 0x49a   : > { %v1382_v0 = vmul.f32 %v1852_v55, %v985_v50  ;;  %v1350_v56 = vpop.f32.mrb[23].mxu1  ;;  %v1390_v62 = vsel %vm629_vm1, %v1381_v51, 0.0 }
 0x49b   : > { %v1380_v57 = vmul.f32 %v1350_v56, %v977_v52  ;;  %v1387_v58 = vsel %vm629_vm1, %v1379_v54, 0.0 }
 0x49c   : > { %v1392_v6 = vsel %vm629_vm1, %v1382_v0, 0.0 }
 0x49d   : > { %v1388_v59 = vsel %vm629_vm1, %v1380_v57, 0.0 }
 0x49e   : > { %v1389_v61 = vadd.f32 %v1388_v59, %v1387_v58 }
 0x49f   : > { %v1855_v63 = vpop.f32.mrb[24].mxu1 }
 0x4a0   : > { %v1391_v2 = vadd.f32 %v1390_v62, %v1389_v61  ;;  %v1385_v3 = vmul.f32 %v1855_v63, %v998_v60  ;;  %v1363_v4 = vpop.f32.mrb[25].mxu1 }
 0x4a1   : > { %v1383_v7 = vmul.f32 %v1363_v4, %v990_v9  ;;  %v1856_v8 = vpop.f32.mrb[26].mxu1 }
 0x4a2   : > { %v1393_v10 = vadd.f32 %v1392_v6, %v1391_v2  ;;  %v1386_v11 = vmul.f32 %v1856_v8, %v1001_v1  ;;  %v1366_v12 = vpop.f32.mrb[27].mxu1  ;;  %v1398_v18 = vsel %vm629_vm1, %v1385_v3, 0.0 }
 0x4a3   : > { %v1394_v13 = vsel %vm629_vm1, %v1383_v7, 0.0  ;;  %v1384_v14 = vmul.f32 %v1366_v12, %v993_v5 }
 0x4a4   : > { %v1395_v15 = vadd.f32 %v1394_v13, %v1393_v10  ;;  %v1400_v20 = vsel %vm629_vm1, %v1386_v11, 0.0 }
 0x4a5   : > { %v1396_v16 = vsel %vm629_vm1, %v1384_v14, 0.0 }
 0x4a6   : > { %v1397_v17 = vadd.f32 %v1396_v16, %v1395_v15 }
 0x4a8   : > { %v1399_v19 = vadd.f32 %v1398_v18, %v1397_v17 }
 0x4aa   : > { %v1401_v21 = vadd.f32 %v1400_v20, %v1399_v19 }
 0x4ac   : > { %v1402_v22 = vrot.slane %v1401_v21, 4 }
 0x4ae   : > { %v1403_v23 = vadd.f32 %v1402_v22, %v1401_v21 }
 0x4b0   : > { %v1404_v24 = vrot.slane %v1403_v23, 2 }
 0x4b2   : > { %v1405_v25 = vadd.f32 %v1404_v24, %v1403_v23 }
 0x4b4   : > { %v1406_v26 = vrot.slane %v1405_v25, 1 }
 0x4b6   : > { %v1407_v27 = vadd.f32 %v1406_v26, %v1405_v25 }
 0x4b8   : > { %v1408_v28 = vadd.f32 %v1407_v27, %v1378_v42 }
 0x4ba   : > { %v1409_v29 = vpack.c.bf16 %v1408_v28, %v1408_v28 }
 0x4bc   : > { %1862 = vmatmul.mubr.msk.bf16.vlgmr.msra.gmra.mrb[24].mxu0 %vm629_vm1, %v1409_v29 }
 0x58f   : > { %v1464_v31 = vpop.f32.mrb[24].mxu0 }
 0x590   : > { %v1465_v32 = vadd.f32 %v1464_v31, %v1414_v30  ;;  %v1863_v44 = vpop.f32.mrb[25].mxu0 }
 0x591   : > { %v1467_v33 = vpop.f32.mrb[26].mxu0 }
 0x592   : > { %v1864_v34 = vpop.f32.mrb[27].mxu0  ;;  %1471 = vst.msk [vmem:[%s619_s15] sm:$0x1] %vm1470_vm4, %v1465_v32 }
 0x593   : > { %2448 = shalt.err (!%p2445_p7)
}
 0x594   : > { %s2449_s16 = scalar_lea.hbm %s3162_s24, 16  ;;  %s2453_s23 = scalar_lea.hbm %s3267_s3, 32 }
 0x595   : > { %p2450_p6 = scmp.ne.s32.totalorder %s3162_s24, %s2449_s16  ;;  %p2454_p1 = scmp.lt.u32.totalorder %s3162_s24, %s3267_s3 }
 0x596   : > { %p2455_p13 = scmp.lt.u32.totalorder %s2453_s23, %s2449_s16  ;;  %p2457_p2 = scmp.lt.u32.totalorder %s2449_s16, %s3162_s24 }
 0x597   : > { %p2451_p9 = pnand %p2450_p6, %p3268_p8 }
 0x598   : > { %p2456_p0 = por %p2455_p13, %p2454_p1 }
 0x599   : > { %p2452_p4 = pneg %p2451_p9 }
 0x59a   : > { %p2458_p10 = por %p2457_p2, %p2456_p0 }
 0x59c   : > { %p2459_p11 = pnand %p2458_p10, %p2452_p4 }
 0x59e   : > { %2462 = shalt.err (!%p2459_p11)
}
 0x59f   : > { %1916 = dma.vmem_to_hbm [thread:$0]  (%p3268_p8), %s3164_s14, 16, %s3162_s24, %s1473_s21  }
 0x5a0 PF: > { %s1497_s22 = sand.u32 1, %s2513_s25   ;;  %p3269_p12 = scmp.ne.s32.totalorder %s3248_s17, 0 }
 0x5a1   : > { %p3270_p3 = scmp.ge.s32.totalorder %s2525_s28, 2  ;;  %s1498_s13 = scalar_lea.sflag [#allocation4], %s1497_s22 }
 0x5a3   : > { %p1960_p5 = pnand %p3270_p3, %p3269_p12 }
 0x5a5   : > { %2508 = dma.done.wait (!%p1960_p5), %s1498_s13, 16  }
 0x5a6   : > { %2510 = vsyncadd (!%p1960_p5), %s1498_s13, 4294967280  ;;  %p32_p7 = scmp.ge.s32.totalorder %s2920_s18, 4   ;;  %s3271_s25 = smov %s2517_s26 }
 0x5a7   : > { %s3272_s26 = smov %s2521_s27  ;;  %s3273_s27 = smov %s2931_s5 }
 0x5a8   : > { %s3274_s28 = smov %s2920_s18  ;;  %34 = sbr.rel (!%p32_p7) target bundleno = 17 (0x11), region = 165 }
 0x5af   :  { %1502 = vsyncpa [#allocation3], 1 }
 0x5b0   :  { %1504 = vsyncpa [#allocation3 + $0x1], 1 }
 0x5b1   :  { %1505 = vsyncpa [#allocation6], 1 }
 0x5b2   :  { %1506 = vsyncpa [#allocation9], 1 }
 0x5b3   :  { %1507 = vsyncpa [#allocation12], 1 }
 0x5b4   :  { %1508 = vsyncpa [#allocation15], 1 }
 0x5b5   :  { %1509 = vsyncpa [#allocation18], 1 }
 0x5b6   :  { %1510 = vsyncpa [#allocation21], 1 }
 0x5b7   :  { %1511 = vsyncpa [#allocation4], 1 }
 0x5b8   :  { %1513 = vsyncpa [#allocation4 + $0x1], 1 }

</bundles_post_ra>
